<compile_context>
chip_gen: v5e
topology: v5e:2x2
jax: 0.10.0
libtpu: 0.0.40
codegen_flags: <defaults>
</compile_context>

<pallas_src>
import functools

import jax
import jax.numpy as jnp
from jax.experimental import pallas as pl
from jax.experimental.pallas import tpu as pltpu


def _round_up(a, m):
    return (a + m - 1) // m * m


def _pick_divisor_tile(total, want, align=128):
    """Largest multiple of `align` <= `want` that divides `total`; falls back to `total`."""
    t = min(want, total)
    t = (t // align) * align
    while t >= align:
        if total % t == 0:
            return t
        t -= align
    return total


def _moe_kernel(flags_ref, eff_e_ref, eff_i_ref,   # SMEM scalar-prefetch
                scale_ref,          # (TN, 1)    routing weight of expert e for tokens in tile t
                x_ref,              # (TN, C)    token activations
                w1_ref, w2_ref,     # (1, C, TI) expert fc_1 / fc_2 weight I-slices
                wp_ref,             # (1, TI, C) expert proj weight I-slice
                y_ref,              # (TN, C)    output tile
                acc_ref):           # VMEM scratch (TN, C) f32 accumulator
    del eff_e_ref, eff_i_ref        # only consumed by the weight index_maps
    t = pl.program_id(0)
    e = pl.program_id(1)
    i = pl.program_id(2)
    n_e = pl.num_programs(1)
    n_i = pl.num_programs(2)

    @pl.when((e == 0) & (i == 0))
    def _init():
        acc_ref[...] = jnp.zeros_like(acc_ref)

    @pl.when(flags_ref[t * n_e + e] > 0)
    def _compute():
        xb = x_ref[...]
        h1 = jnp.dot(xb, w1_ref[0], preferred_element_type=jnp.float32)
        h2 = jnp.dot(xb, w2_ref[0], preferred_element_type=jnp.float32)
        h = (h1 * jax.nn.sigmoid(h1)) * h2                       # silu(fc_1) * fc_2, this I-slice
        out = jnp.dot(h.astype(xb.dtype), wp_ref[0],
                      preferred_element_type=jnp.float32)        # (TN, C) partial proj
        acc_ref[...] += scale_ref[...] * out

    @pl.when((e == n_e - 1) & (i == n_i - 1))
    def _finalize():
        y_ref[...] = acc_ref[...].astype(y_ref.dtype)


@functools.partial(jax.jit, static_argnames=("n_expert_per_token", "token_tile", "i_tile",
                                             "compute_dtype"))
def llama_moe_forward(x, gate_w, w1, w2, wp, *, n_expert_per_token,
                      token_tile=256, i_tile=512, compute_dtype=None):
    """LLaMAMoE forward.

    x:      (B, T, C)
    gate_w: (C, E)        -- gate.weight.T (bias-free)
    w1, w2: (E, C, I)     -- stacked fc_1.weight.T / fc_2.weight.T per expert
    wp:     (E, I, C)     -- stacked proj.weight.T per expert
    token_tile / i_tile:  tune per chip (v5e: 128/large tI; v6e: 256/>=256; v7x: 256/<=1024).
    compute_dtype:        e.g. jnp.bfloat16 to halve HBM traffic and ~2-4x MXU rate.
    # TODO(synk): config.bias=True (per-expert fc_1/fc_2/proj biases) not implemented;
    #             LLaMA / Mixtral configs use bias=False.
    """
    B, T, C = x.shape
    E = gate_w.shape[-1]
    inter = w1.shape[-1]
    N = B * T
    out_dtype = x.dtype
    x2 = x.reshape(N, C)

    # ---- routing (tiny O(N*C*E)) in plain JAX ----
    # TODO(synk): top-k + softmax routing has no clean Pallas TPU equivalent; kept in JAX.
    router = jnp.dot(x2, gate_w, preferred_element_type=jnp.float32)        # (N, E)
    probs, idx = jax.lax.top_k(router, n_expert_per_token)                  # (N, k)
    probs = jax.nn.softmax(probs.astype(jnp.float32), axis=-1)
    one_hot = jax.nn.one_hot(idx, E, dtype=jnp.float32)                     # (N, k, E)
    w_dense = jnp.einsum("nk,nke->ne", probs, one_hot).astype(out_dtype)    # (N, E)

    # optional lower-precision compute (keep f32 MXU accumulation + f32 acc scratch)
    cdtype = jnp.dtype(compute_dtype) if compute_dtype is not None else jnp.dtype(x.dtype)
    x2 = x2.astype(cdtype)
    w1 = w1.astype(cdtype)
    w2 = w2.astype(cdtype)
    wp = wp.astype(cdtype)

    # ---- token tiling (sublane-aligned, never below 128 rows so the MXU M-dim stays fed) ----
    tn = _round_up(min(token_tile, max(128, _round_up(N, 8))), 8)
    Np = _round_up(N, tn)
    if Np != N:
        x2 = jnp.pad(x2, ((0, Np - N), (0, 0)))
        w_dense = jnp.pad(w_dense, ((0, Np - N), (0, 0)))
    n_tiles = Np // tn

    # ---- intermediate-dim tiling ----
    tI = _pick_divisor_tile(inter, i_tile, align=128)
    n_i = inter // tI

    # per-(tile, expert) activity flags: skip compute *and* weight DMA for unused experts
    flags_te = jnp.any(w_dense.reshape(n_tiles, tn, E) != 0, axis=1)        # (n_tiles, E)
    flags = flags_te.astype(jnp.int32).reshape(-1)                          # (n_tiles*E,)

    # Per-step "effective" (expert, I-slice) indices: sticky at the last *active* step so that
    # inactive steps return the previously fetched weight block index -> Pallas skips the DMA.
    n_steps = n_tiles * E * n_i
    step_active = jnp.repeat(flags, n_i)                                    # (n_steps,)
    step_idx = jnp.arange(n_steps, dtype=jnp.int32)
    last_active = jax.lax.cummax(jnp.where(step_active > 0, step_idx, -1), axis=0)
    last_active = jnp.maximum(last_active, 0)
    eff_e = ((last_active // n_i) % E).astype(jnp.int32)                    # (n_steps,)
    eff_i = (last_active % n_i).astype(jnp.int32)                           # (n_steps,)

    # routing scale laid out for direct BlockSpec selection: (n_tiles, E, tn, 1), f32
    scale = w_dense.astype(jnp.float32).reshape(n_tiles, tn, E).transpose(0, 2, 1)[..., None]

    def _w1_map(t, e, i, flags_r, eff_e_r, eff_i_r):
        s = (t * E + e) * n_i + i
        return (eff_e_r[s], 0, eff_i_r[s])

    def _wp_map(t, e, i, flags_r, eff_e_r, eff_i_r):
        s = (t * E + e) * n_i + i
        return (eff_e_r[s], eff_i_r[s], 0)

    grid_spec = pltpu.PrefetchScalarGridSpec(
        num_scalar_prefetch=3,                       # flags, eff_e, eff_i land in SMEM
        grid=(n_tiles, E, n_i),                      # expert & I-slice are reduction axes
        in_specs=[
            pl.BlockSpec((None, None, tn, 1), lambda t, e, i, *_: (t, e, 0, 0)),   # routing scale
            pl.BlockSpec((tn, C), lambda t, e, i, *_: (t, 0)),                     # x tile (1 fetch/tile)
            pl.BlockSpec((1, C, tI), _w1_map),                                     # fc_1 I-slice
            pl.BlockSpec((1, C, tI), _w1_map),                                     # fc_2 I-slice
            pl.BlockSpec((1, tI, C), _wp_map),                                     # proj I-slice
        ],
        out_specs=pl.BlockSpec((tn, C), lambda t, e, i, *_: (t, 0)),
        scratch_shapes=[pltpu.VMEM((tn, C), jnp.float32)],
    )

    # Explicit VMEM budget from the chosen tiles (double-buffered inputs/outputs + f32 acc),
    # with 2x headroom, capped at 64 MiB so a tiling that fits v5e/v6e also fits v7x.
    bpe = jnp.dtype(cdtype).itemsize
    est = 2 * (tn * C + 3 * C * tI + tn * C + tn) * bpe + tn * C * 4
    vmem_limit = int(min(max(2 * est, 32 * 1024 * 1024), 64 * 1024 * 1024))

    y = pl.pallas_call(
        _moe_kernel,
        grid_spec=grid_spec,
        out_shape=jax.ShapeDtypeStruct((Np, C), out_dtype),
        compiler_params=pltpu.CompilerParams(
            dimension_semantics=("parallel", "arbitrary", "arbitrary"),
            vmem_limit_bytes=vmem_limit),
    )(flags, eff_e, eff_i, scale, x2, w1, w2, wp)

    return y[:N].reshape(B, T, C)


if __name__ == "__main__":
    B, T, C = 2, 8, 128          # batch, seq, n_embd
    INTER = 256                  # intermediate_size
    E = 4                        # n_expert
    K = 2                        # n_expert_per_token

    key = jax.random.PRNGKey(0)
    kx, kg, k1, k2, kp = jax.random.split(key, 5)
    x = jax.random.normal(kx, (B, T, C), jnp.float32)
    gate_w = jax.random.normal(kg, (C, E), jnp.float32) * (1.0 / jnp.sqrt(C))
    w1 = jax.random.normal(k1, (E, C, INTER), jnp.float32) * (1.0 / jnp.sqrt(C))
    w2 = jax.random.normal(k2, (E, C, INTER), jnp.float32) * (1.0 / jnp.sqrt(C))
    wp = jax.random.normal(kp, (E, INTER, C), jnp.float32) * (1.0 / jnp.sqrt(INTER))

    y = llama_moe_forward(x, gate_w, w1, w2, wp, n_expert_per_token=K)
    jax.block_until_ready(y)

    # pure-JAX reference (dense form of the PyTorch per-expert scatter loop; identical math,
    # since tokens not routed to an expert get weight exactly 0)
    x2 = x.reshape(-1, C)
    router_ref = jnp.dot(x2, gate_w, preferred_element_type=jnp.float32)
    probs_ref, idx_ref = jax.lax.top_k(router_ref, K)
    probs_ref = jax.nn.softmax(probs_ref.astype(jnp.float32), axis=-1).astype(x.dtype)
    y_ref = jnp.zeros_like(x2)
    for e in range(E):
        h = jax.nn.silu(x2 @ w1[e]) * (x2 @ w2[e])
        out_e = h @ wp[e]
        w_e = jnp.sum(jnp.where(idx_ref == e, probs_ref, 0.0), axis=-1)
        y_ref = y_ref + w_e[:, None] * out_e
    y_ref = y_ref.reshape(B, T, C)

    assert y.shape == (B, T, C)
    err = float(jnp.max(jnp.abs(y - y_ref)))
    assert jnp.allclose(y, y_ref, atol=1e-4, rtol=1e-4), f"max abs err {err}"
    print("KERNEL_OK")
</pallas_src>

<mosaic_0001>
module attributes {stable_mosaic.version = 11 : i64} {
  func.func @_moe_kernel(%arg0: i32, %arg1: i32, %arg2: i32, %arg3: memref<4xi32, #tpu.memory_space<smem>>, %arg4: memref<4xi32, #tpu.memory_space<smem>>, %arg5: memref<4xi32, #tpu.memory_space<smem>>, %arg6: memref<1x1x128x1xf32, #tpu.memory_space<vmem>>, %arg7: memref<128x128xf32, #tpu.memory_space<vmem>>, %arg8: memref<1x128x256xf32, #tpu.memory_space<vmem>>, %arg9: memref<1x128x256xf32, #tpu.memory_space<vmem>>, %arg10: memref<1x256x128xf32, #tpu.memory_space<vmem>>, %arg11: memref<128x128xf32, #tpu.memory_space<vmem>>, %arg12: memref<128x128xf32, #tpu.memory_space<vmem>>) attributes {dimension_semantics = [#tpu.dimension_semantics<parallel>, #tpu.dimension_semantics<arbitrary>, #tpu.dimension_semantics<arbitrary>], iteration_bounds = array<i64: 1, 4, 1>, scalar_prefetch = 3 : i64, scratch_operands = 1 : i64, tpu.core_type = #tpu.core_type<tc>, window_params = [{transform_indices = @transform_0, window_bounds = array<i64: 1, 1, 128, 1>}, {transform_indices = @transform_1, window_bounds = array<i64: 128, 128>}, {transform_indices = @transform_2, window_bounds = array<i64: 1, 128, 256>}, {transform_indices = @transform_3, window_bounds = array<i64: 1, 128, 256>}, {transform_indices = @transform_4, window_bounds = array<i64: 1, 256, 128>}, {transform_indices = @transform_5, window_bounds = array<i64: 128, 128>}]} {
    %c0_i32 = arith.constant 0 : i32
    %0 = arith.cmpi eq, %arg1, %c0_i32 : i32
    %c0_i32_0 = arith.constant 0 : i32
    %1 = arith.cmpi eq, %arg2, %c0_i32_0 : i32
    %2 = arith.andi %0, %1 : i1
    %3 = arith.extui %2 : i1 to i32
    %c0_i32_1 = arith.constant 0 : i32
    %4 = arith.cmpi ne, %3, %c0_i32_1 : i32
    scf.if %4 {
      %cst = arith.constant 0.000000e+00 : f32
      %17 = vector.broadcast %cst : f32 to vector<128x128xf32>
      %c0 = arith.constant 0 : index
      %c0_6 = arith.constant 0 : index
      %18 = vector.load %arg12[%c0, %c0_6] : memref<128x128xf32, #tpu.memory_space<vmem>>, vector<128x128xf32>
      tpu.vector_store %arg12[%c0, %c0_6], %17 {strides = array<i32>} : memref<128x128xf32, #tpu.memory_space<vmem>>, vector<128x128xf32>,
    } else {
    }
    %c4_i32 = arith.constant 4 : i32
    %5 = arith.muli %arg0, %c4_i32 : i32
    %6 = arith.addi %5, %arg1 : i32
    %7 = arith.index_cast %6 : i32 to index
    %8 = memref.load %arg3[%7] : memref<4xi32, #tpu.memory_space<smem>>
    %c0_i32_2 = arith.constant 0 : i32
    %9 = arith.cmpi sgt, %8, %c0_i32_2 : i32
    %10 = arith.extui %9 : i1 to i32
    %c0_i32_3 = arith.constant 0 : i32
    %11 = arith.cmpi ne, %10, %c0_i32_3 : i32
    scf.if %11 {
      %c0 = arith.constant 0 : index
      %c0_6 = arith.constant 0 : index
      %17 = vector.load %arg7[%c0, %c0_6] : memref<128x128xf32, #tpu.memory_space<vmem>>, vector<128x128xf32>
      %c0_7 = arith.constant 0 : index
      %c0_8 = arith.constant 0 : index
      %c0_9 = arith.constant 0 : index
      %18 = vector.load %arg8[%c0_7, %c0_8, %c0_9] : memref<1x128x256xf32, #tpu.memory_space<vmem>>, vector<1x128x256xf32>
      %19 = vector.shape_cast %18 : vector<1x128x256xf32> to vector<128x256xf32>
      %cst = arith.constant dense<0.000000e+00> : vector<128x256xf32>
      %20 = tpu.matmul %17, %19, %cst {dimension_numbers = #tpu.dot_dimension_numbers<[1], [0], [0], [1], [0, 0, 1, 1], [], []>} : vector<128x128xf32>, vector<128x256xf32>, vector<128x256xf32> -> vector<128x256xf32>
      %c0_10 = arith.constant 0 : index
      %c0_11 = arith.constant 0 : index
      %c0_12 = arith.constant 0 : index
      %21 = vector.load %arg9[%c0_10, %c0_11, %c0_12] : memref<1x128x256xf32, #tpu.memory_space<vmem>>, vector<1x128x256xf32>
      %22 = vector.shape_cast %21 : vector<1x128x256xf32> to vector<128x256xf32>
      %cst_13 = arith.constant dense<0.000000e+00> : vector<128x256xf32>
      %23 = tpu.matmul %17, %22, %cst_13 {dimension_numbers = #tpu.dot_dimension_numbers<[1], [0], [0], [1], [0, 0, 1, 1], [], []>} : vector<128x128xf32>, vector<128x256xf32>, vector<128x256xf32> -> vector<128x256xf32>
      %24 = arith.negf %20 : vector<128x256xf32>
      %25 = math.exp %24 : vector<128x256xf32>
      %cst_14 = arith.constant 1.000000e+00 : f32
      %26 = vector.broadcast %cst_14 : f32 to vector<128x256xf32>
      %27 = arith.addf %26, %25 : vector<128x256xf32>
      %28 = arith.divf %26, %27 : vector<128x256xf32>
      %29 = arith.mulf %20, %28 : vector<128x256xf32>
      %30 = arith.mulf %29, %23 : vector<128x256xf32>
      %c0_15 = arith.constant 0 : index
      %c0_16 = arith.constant 0 : index
      %c0_17 = arith.constant 0 : index
      %31 = vector.load %arg10[%c0_15, %c0_16, %c0_17] : memref<1x256x128xf32, #tpu.memory_space<vmem>>, vector<1x256x128xf32>
      %32 = vector.shape_cast %31 : vector<1x256x128xf32> to vector<256x128xf32>
      %cst_18 = arith.constant dense<0.000000e+00> : vector<128x128xf32>
      %33 = tpu.matmul %30, %32, %cst_18 {dimension_numbers = #tpu.dot_dimension_numbers<[1], [0], [0], [1], [0, 0, 1, 1], [], []>} : vector<128x256xf32>, vector<256x128xf32>, vector<128x128xf32> -> vector<128x128xf32>
      %c0_19 = arith.constant 0 : index
      %c0_20 = arith.constant 0 : index
      %34 = vector.load %arg12[%c0_19, %c0_20] : memref<128x128xf32, #tpu.memory_space<vmem>>, vector<128x128xf32>
      %c0_21 = arith.constant 0 : index
      %c0_22 = arith.constant 0 : index
      %c0_23 = arith.constant 0 : index
      %c0_24 = arith.constant 0 : index
      %35 = vector.load %arg6[%c0_21, %c0_22, %c0_23, %c0_24] : memref<1x1x128x1xf32, #tpu.memory_space<vmem>>, vector<1x1x128x1xf32>
      %36 = vector.shape_cast %35 : vector<1x1x128x1xf32> to vector<128x1xf32>
      %37 = vector.broadcast %36 : vector<128x1xf32> to vector<128x128xf32>
      %38 = arith.mulf %37, %33 : vector<128x128xf32>
      %39 = arith.addf %34, %38 : vector<128x128xf32>
      %c0_25 = arith.constant 0 : index
      %c0_26 = arith.constant 0 : index
      %40 = vector.load %arg12[%c0_25, %c0_26] : memref<128x128xf32, #tpu.memory_space<vmem>>, vector<128x128xf32>
      tpu.vector_store %arg12[%c0_25, %c0_26], %39 {strides = array<i32>} : memref<128x128xf32, #tpu.memory_space<vmem>>, vector<128x128xf32>,
    } else {
    }
    %c3_i32 = arith.constant 3 : i32
    %12 = arith.cmpi eq, %arg1, %c3_i32 : i32
    %c0_i32_4 = arith.constant 0 : i32
    %13 = arith.cmpi eq, %arg2, %c0_i32_4 : i32
    %14 = arith.andi %12, %13 : i1
    %15 = arith.extui %14 : i1 to i32
    %c0_i32_5 = arith.constant 0 : i32
    %16 = arith.cmpi ne, %15, %c0_i32_5 : i32
    scf.if %16 {
      %c0 = arith.constant 0 : index
      %c0_6 = arith.constant 0 : index
      %17 = vector.load %arg12[%c0, %c0_6] : memref<128x128xf32, #tpu.memory_space<vmem>>, vector<128x128xf32>
      %c0_7 = arith.constant 0 : index
      %c0_8 = arith.constant 0 : index
      %18 = vector.load %arg11[%c0_7, %c0_8] : memref<128x128xf32, #tpu.memory_space<vmem>>, vector<128x128xf32>
      tpu.vector_store %arg11[%c0_7, %c0_8], %17 {strides = array<i32>} : memref<128x128xf32, #tpu.memory_space<vmem>>, vector<128x128xf32>,
    } else {
    }
    return
  }
  func.func @transform_0(%arg0: i32, %arg1: i32, %arg2: i32, %arg3: memref<4xi32, #tpu.memory_space<smem>>, %arg4: memref<4xi32, #tpu.memory_space<smem>>, %arg5: memref<4xi32, #tpu.memory_space<smem>>) -> (i32, i32, i32, i32) {
    %c0_i32 = arith.constant 0 : i32
    %c0_i32_0 = arith.constant 0 : i32
    %c0_i32_1 = arith.constant 0 : i32
    return %arg0, %arg1, %c0_i32, %c0_i32_0 : i32, i32, i32, i32
  }
  func.func @transform_1(%arg0: i32, %arg1: i32, %arg2: i32, %arg3: memref<4xi32, #tpu.memory_space<smem>>, %arg4: memref<4xi32, #tpu.memory_space<smem>>, %arg5: memref<4xi32, #tpu.memory_space<smem>>) -> (i32, i32) {
    %c0_i32 = arith.constant 0 : i32
    %c0_i32_0 = arith.constant 0 : i32
    return %arg0, %c0_i32 : i32, i32
  }
  func.func @transform_2(%arg0: i32, %arg1: i32, %arg2: i32, %arg3: memref<4xi32, #tpu.memory_space<smem>>, %arg4: memref<4xi32, #tpu.memory_space<smem>>, %arg5: memref<4xi32, #tpu.memory_space<smem>>) -> (i32, i32, i32) {
    %c4_i32 = arith.constant 4 : i32
    %0 = arith.muli %arg0, %c4_i32 : i32
    %1 = arith.addi %0, %arg1 : i32
    %c1_i32 = arith.constant 1 : i32
    %2 = arith.muli %1, %c1_i32 : i32
    %3 = arith.addi %2, %arg2 : i32
    %4 = arith.index_cast %3 : i32 to index
    %5 = memref.load %arg4[%4] : memref<4xi32, #tpu.memory_space<smem>>
    %6 = arith.index_cast %3 : i32 to index
    %7 = memref.load %arg5[%6] : memref<4xi32, #tpu.memory_space<smem>>
    %c0_i32 = arith.constant 0 : i32
    %c0_i32_0 = arith.constant 0 : i32
    return %5, %c0_i32, %7 : i32, i32, i32
  }
  func.func @transform_3(%arg0: i32, %arg1: i32, %arg2: i32, %arg3: memref<4xi32, #tpu.memory_space<smem>>, %arg4: memref<4xi32, #tpu.memory_space<smem>>, %arg5: memref<4xi32, #tpu.memory_space<smem>>) -> (i32, i32, i32) {
    %c4_i32 = arith.constant 4 : i32
    %0 = arith.muli %arg0, %c4_i32 : i32
    %1 = arith.addi %0, %arg1 : i32
    %c1_i32 = arith.constant 1 : i32
    %2 = arith.muli %1, %c1_i32 : i32
    %3 = arith.addi %2, %arg2 : i32
    %4 = arith.index_cast %3 : i32 to index
    %5 = memref.load %arg4[%4] : memref<4xi32, #tpu.memory_space<smem>>
    %6 = arith.index_cast %3 : i32 to index
    %7 = memref.load %arg5[%6] : memref<4xi32, #tpu.memory_space<smem>>
    %c0_i32 = arith.constant 0 : i32
    %c0_i32_0 = arith.constant 0 : i32
    return %5, %c0_i32, %7 : i32, i32, i32
  }
  func.func @transform_4(%arg0: i32, %arg1: i32, %arg2: i32, %arg3: memref<4xi32, #tpu.memory_space<smem>>, %arg4: memref<4xi32, #tpu.memory_space<smem>>, %arg5: memref<4xi32, #tpu.memory_space<smem>>) -> (i32, i32, i32) {
    %c4_i32 = arith.constant 4 : i32
    %0 = arith.muli %arg0, %c4_i32 : i32
    %1 = arith.addi %0, %arg1 : i32
    %c1_i32 = arith.constant 1 : i32
    %2 = arith.muli %1, %c1_i32 : i32
    %3 = arith.addi %2, %arg2 : i32
    %4 = arith.index_cast %3 : i32 to index
    %5 = memref.load %arg4[%4] : memref<4xi32, #tpu.memory_space<smem>>
    %6 = arith.index_cast %3 : i32 to index
    %7 = memref.load %arg5[%6] : memref<4xi32, #tpu.memory_space<smem>>
    %c0_i32 = arith.constant 0 : i32
    %c0_i32_0 = arith.constant 0 : i32
    return %5, %7, %c0_i32 : i32, i32, i32
  }
  func.func @transform_5(%arg0: i32, %arg1: i32, %arg2: i32, %arg3: memref<4xi32, #tpu.memory_space<smem>>, %arg4: memref<4xi32, #tpu.memory_space<smem>>, %arg5: memref<4xi32, #tpu.memory_space<smem>>) -> (i32, i32) {
    %c0_i32 = arith.constant 0 : i32
    %c0_i32_0 = arith.constant 0 : i32
    return %arg0, %c0_i32 : i32, i32
  }
}

</mosaic_0001>

<bundles_post_ra>
// kernel: llama_moe_forward.1
= control target key start
LH: loop header
LB: loop body
LE: loop exit
PB: predicated region body
PF: predicated region fallthrough
CT: control target
= control target key end

     0   :  { %s2673_s11 = smov [#allocation4]   ;;  %s2674_s12 = smov [#allocation5]   ;;  %s4394_s0 = inlined_call_operand.vmem [shape: s32[4], index: 0, kind: input, shape index: {}]   ;;  %s4395_s3 = inlined_call_operand.vmem [shape: f32[1,4,128,1], index: 3, kind: input, shape index: {}]   ;;  %s4396_s4 = inlined_call_operand.vmem [shape: f32[128,128], index: 4, kind: input, shape index: {}]   ;;  %s4397_s5 = inlined_call_operand.hbm [shape: f32[4,128,256], index: 5, kind: input, shape index: {}]   ;;  %s4398_s6 = inlined_call_operand.hbm [shape: f32[4,128,256], index: 6, kind: input, shape index: {}]   ;;  %s4399_s7 = inlined_call_operand.hbm [shape: f32[4,256,128], index: 7, kind: input, shape index: {}]   ;;  %s4400_s8 = inlined_call_operand.vmem [shape: f32[128,128], index: 8, kind: output, shape index: {}]   ;;  %s4401_s1 = inlined_call_operand.vmem [shape: s32[4], index: 1, kind: input, shape index: {}]   ;;  %s4402_s2 = inlined_call_operand.vmem [shape: s32[4], index: 2, kind: input, shape index: {}]  }
   0x1   :  { %4428 = sst [smem:[#allocation48_spill]] %s4395_s3  ;;  %s14_s29 = sshll.u32 %s4394_s0, 4  ;;  %s15_s29 = int_to_ptr.vmem [resolvable:$true] %s14_s29 }
   0x2   :  { %4429 = sst [smem:[#allocation49_spill]] %s4396_s4  ;;  %s19_s10 = sshll.u32 %s4401_s1, 4  ;;  %s20_s10 = int_to_ptr.vmem [resolvable:$true] %s19_s10 }
   0x3   :  { %4430 = sst [smem:[#allocation50_spill]] %s4397_s5  ;;  %s24_s15 = sshll.u32 %s4402_s2, 4  ;;  %s25_s15 = int_to_ptr.vmem [resolvable:$true] %s24_s15 }
   0x4   :  { %4431 = sst [smem:[#allocation51_spill]] %s4398_s6  ;;  %s2675_s16 = smov [#allocation6]  }
   0x5   :  { %4432 = sst [smem:[#allocation52_spill]] %s4400_s8 }
   0x6   :  { %17 = dma.vmem_to_smem %s15_s29, 16, %s2673_s11, [#allocation3] }
   0x7   :  { %22 = dma.vmem_to_smem %s20_s10, 16, %s2674_s12, [#allocation3] }
   0x8   :  { %27 = dma.vmem_to_smem %s25_s15, 16, %s2675_s16, [#allocation3] }
   0x9   :  { %2611 = dma.done.wait [#allocation3], 48 }
   0xa   :  { %2612 = vsyncadd [#allocation3], 4294967248 }
   0xb   :  { %30 = sfence }
   0xc   :  { %31 = vsyncpa [#allocation8], 0 }
   0xd   :  { %33 = vsyncpa [#allocation8 + $0x1], 0 }
   0xe   :  { %34 = vsyncpa [#allocation10], 0 }
   0xf   :  { %36 = vsyncpa [#allocation10 + $0x1], 0  ;;  %s2736_s0 = smov 0   ;;  %s2738_s1 = smov 0  }
  0x10   :  { %s2740_s17 = smov 0   ;;  %s2742_s18 = smov 0  }
  0x11   :  { %s2744_s19 = smov 0   ;;  %s2746_s2 = smov 0  }
  0x12   :  { %s2748_s20 = smov 0   ;;  %s2750_s21 = smov 0  }
  0x13   :  { %s2752_s22 = smov 0   ;;  %s2754_s23 = smov 0  }
  0x14   :  { %s2756_s24 = smov 0   ;;  %s2758_s25 = smov 0  }
  0x15 LB: > { %4433 = sst [smem:[#allocation28_spill]] %s2643_s19  ;;  %s4403_s26 = sadd.s32 4294967295, %s2671_s25   ;;  %s2671_s25 = sphi %s2758_s25, %s42_s25   ;;  %s2667_s24 = sphi %s2756_s24, %s4599_s24   ;;  %s2663_s23 = sphi %s2754_s23, %s4598_s23   ;;  %s2659_s22 = sphi %s2752_s22, %s4597_s22   ;;  %s2655_s21 = sphi %s2750_s21, %s4596_s21   ;;  %s2651_s20 = sphi %s2748_s20, %s4595_s20   ;;  %s2647_s2 = sphi %s2746_s2, %s4590_s2   ;;  %s2643_s19 = sphi %s2744_s19, %s4589_s19   ;;  %s2639_s18 = sphi %s2742_s18, %s4588_s18   ;;  %s2635_s17 = sphi %s2740_s17, %s4594_s17   ;;  %s2631_s1 = sphi %s2738_s1, %s4593_s1   ;;  %s2627_s0 = sphi %s2736_s0, %s4592_s0  }
  0x16   : > { %4434 = sst [smem:[#allocation29_spill]] %s2647_s2  ;;  %s57_s27 = sadd.s32 1, %s2667_s24 }
  0x17   : > { %4435 = sst [smem:[#allocation30_spill]] %s2663_s23  ;;  %p59_p0 = scmp.ge.s32.totalorder %s57_s27, 4 }
  0x18   : > { %p142_p1 = scmp.eq.s32.totalorder %s2671_s25, 0  ;;  %p2799_p2 = scmp.eq.s32.totalorder %s4403_s26, 0 }
  0x19   : > { %s160_s29 = sld [smem:[#allocation5 + %s2667_s24]]  ;;  %s4601_s27 = smov (%p59_p0, %s57_s27), 0 }
  0x1a   : > { %4437 = sst [smem:[#allocation31_spill]] %s4601_s27  ;;  %s172_s9 = sadd.s32 1, %s2647_s2 }
  0x1b   : > { %s161_s30 = sld [smem:[#allocation6 + %s2667_s24]]  ;;  %p179_p3 = scmp.ne.s32.totalorder %s2647_s2, %s2643_s19 }
  0x1c   : > { %s165_s10 = sld [smem:[#allocation5 + %s4601_s27]]  ;;  %p185_p4 = scmp.ne.s32.totalorder %s2643_s19, %s2639_s18 }
  0x1d   : > { %s166_s11 = sld [smem:[#allocation6 + %s4601_s27]]  ;;  %p2815_p5 = por %p179_p3, %p142_p1 }
  0x1e   : > { %p2821_p6 = por %p185_p4, %p2799_p2  ;;  %p4416_p7 = scmp.lt.s32.totalorder %s2671_s25, 4 }
  0x1f   : > { %s325_s15 = sand.u32 1, %s2647_s2   ;;  %p2080_p10 = scmp.ge.s32.totalorder %s2671_s25, 1 }
  0x20   : > { %s4439_s13 = scalar_select %p2821_p6, 1, 0 }
  0x21   : > { %s2072_s26 = sshll.u32 %s325_s15, 8  ;;  %p2851_p9 = pnand %p4416_p7, %p2815_p5 }
  0x22   : > { %4440 = sst [smem:[#allocation32_spill]] %s4439_s13  ;;  %s167_s16 = ssub.s32 %s160_s29, %s165_s10 }
  0x23   : > { %s168_s18 = ssub.s32 %s161_s30, %s166_s11  ;;  %s327_s4 = scalar_lea.vmem [#allocation9], %s2072_s26 }
  0x24   : > { %s169_s8 = sor.u32 %s168_s18, %s167_s16  ;;  %s2828_s3 = sshll.u32 %s327_s4, 4 }
  0x25   : > { %p170_p8 = scmp.eq.s32.totalorder %s169_s8, 0  ;;  %4441 = sst [smem:[#allocation33_spill]] %s2828_s3 }
  0x26   : > { %s2165_s23 = scalar_select %p2815_p5, [#allocation5], [#allocation14] }
  0x27   : > { %s2833_s13 = scalar_select %p170_p8, %s2647_s2, %s172_s9  }
  0x28   : > { %s2166_s14 = scalar_select %p2815_p5, %s2667_s24, 0 }
  0x29   : > { %4442 = sst [smem:[#allocation34_spill]] %s2833_s13  ;;  %s4603_s23 = smov (!%p4416_p7, %s2165_s23), [#allocation20] }
  0x2a   : > { %s4605_s14 = smov (!%p4416_p7, %s2166_s14), 0  ;;  %p379_p11 = scmp.lt.s32.totalorder %s2671_s25, 5 }
  0x2b   : > { %s2167_s29 = scalar_select %p2815_p5, [#allocation6], [#allocation15] }
  0x2c   : > { %s331_s8 = sld [smem:[%s4603_s23 + %s4605_s14]]  ;;  %p2857_p12 = pnand %p2080_p10, %p379_p11 }
  0x2d   : > { %s4607_s29 = smov (!%p4416_p7, %s2167_s29), [#allocation21]  ;;  %s2862_s11 = sld [smem:[#allocation5 + %s2667_s24]] }
  0x2e   : > { %s332_s26 = sld [smem:[%s4607_s29 + %s4605_s14]]  ;;  %s4446_s2 = sand.u32 1, %s2671_s25  }
  0x2f   : > { %s2865_s15 = sld [smem:[#allocation6 + %s2667_s24]]  ;;  %s2876_s19 = scalar_lea.sflag [#allocation10], %s4446_s2 }
  0x30   : > { %s4445_s6 = sld [smem:[#allocation51_spill]]  ;;  %p2477_p0 = pneg %p2851_p9 }
  0x31   : > { %s2871_s13 = sld [smem:[#allocation5 + %s4601_s27]] }
  0x32   : > { %s2074_s9 = sshll.u32 %s331_s8, 5  ;;  %s128_s29 = sld [smem:[#allocation6 + %s4601_s27]] }
  0x34   : > { %s2073_s23 = sshll.u32 %s332_s26, 1 }
  0x35   : > { %s337_s10 = sadd.s32 %s2074_s9, %s2073_s23 }
  0x36   : > { %s2075_s12 = sshll.u32 %s337_s10, 3  ;;  %s2480_s10 = scalar_lea.hbm %s4445_s6, 1024 }
  0x37   : > { %s339_s3 = scalar_lea.hbm %s4445_s6, %s2075_s12 }
  0x38   : > { %s340_s14 = sshll.u32 %s339_s3, 4  ;;  %s341_s14 = int_to_ptr.hbm [resolvable:$true] %s340_s14 }
  0x39   : > { %s2473_s8 = sshra.s32 %s341_s14, 4  ;;  %s2474_s8 = int_to_ptr.hbm [resolvable:$true] %s2473_s8 }
  0x3a   : > { %s2475_s26 = scalar_lea.hbm %s2474_s8, 256  ;;  %p2481_p5 = scmp.lt.s32.totalorder %s2474_s8, %s4445_s6 }
  0x3b   : > { %p2476_p13 = scmp.ne.s32.totalorder %s2474_s8, %s2475_s26  ;;  %p2482_p8 = scmp.lt.s32.totalorder %s2480_s10, %s2475_s26 }
  0x3d   : > { %p2478_p3 = pnand %p2477_p0, %p2476_p13  ;;  %p2483_p10 = por %p2482_p8, %p2481_p5 }
  0x3f   : > { %p2479_p4 = pneg %p2478_p3 }
  0x41   : > { %p2484_p11 = pnand %p2483_p10, %p2479_p4 }
  0x43   : > { %2487 = shalt.err (!%p2484_p11)
}
  0x44   : > { %s4412_s3 = smov 256   ;;  %s4447_s2 = sld [smem:[#allocation33_spill]] }
  0x45   : > { %s4413_s18 = smov 16   ;;  %p141_p13 = scmp.ne.s32.totalorder %s2659_s22, %s2655_s21 }
  0x46   : > { %p147_p0 = scmp.ne.s32.totalorder %s2655_s21, %s2651_s20  ;;  %s134_s26 = sadd.s32 1, %s2659_s22 }
  0x47   : > { %s129_s9 = ssub.s32 %s2862_s11, %s2871_s13  ;;  %s4414_s23 = sand.u32 1, %s2659_s22  }
  0x48   : > { %s130_s10 = ssub.s32 %s2865_s15, %s128_s29  ;;  %p2905_p3 = por %p2799_p2, %p147_p0 }
  0x49   : > { %s131_s4 = sor.u32 %s130_s10, %s129_s9  ;;  %p143_p4 = por %p142_p1, %p141_p13 }
  0x4a   : > { %s4448_s8 = int_to_ptr.vmem [resolvable:$true] %s4447_s2  ;;  %p132_p5 = scmp.eq.s32.totalorder %s131_s4, 0 }
  0x4b   : > { %2192 = dma.hbm_to_vmem [thread:$0]  (!%p2851_p9), %s341_s14, 4096, %s4448_s8, %s2876_s19, %s4412_s3, %s4412_s3, %s4413_s18  }
  0x4c   : > { %s2068_s14 = sshll.u32 %s4414_s23, 8  ;;  %p2915_p9 = pnand %p4416_p7, %p143_p4 }
  0x4d   : > { %s2920_s13 = scalar_select %p132_p5, %s2659_s22, %s134_s26  }
  0x4e   : > { %s2160_s11 = scalar_select %p143_p4, [#allocation5], [#allocation12] }
  0x4f   : > { %s2161_s15 = scalar_select %p143_p4, %s2667_s24, 0 }
  0x50   : > { %s4609_s11 = smov (!%p4416_p7, %s2160_s11), [#allocation18]  ;;  %s298_s8 = scalar_lea.vmem [#allocation7], %s2068_s14 }
  0x51   : > { %s4611_s15 = smov (!%p4416_p7, %s2161_s15), 0  ;;  %s2929_s9 = sshll.u32 %s298_s8, 4  ;;  %s314_s9 = int_to_ptr.vmem [resolvable:$true] %s2929_s9 }
  0x52   : > { %s2162_s29 = scalar_select %p143_p4, [#allocation6], [#allocation13] }
  0x53   : > { %s302_s16 = sld [smem:[%s4609_s11 + %s4611_s15]]  ;;  %p217_p8 = scmp.ne.s32.totalorder %s2635_s17, %s2631_s1 }
  0x54   : > { %s4613_s29 = smov (!%p4416_p7, %s2162_s29), [#allocation19]  ;;  %s2932_s26 = sld [smem:[#allocation5 + %s2667_s24]] }
  0x55   : > { %s303_s2 = sld [smem:[%s4613_s29 + %s4611_s15]]  ;;  %p223_p10 = scmp.ne.s32.totalorder %s2631_s1, %s2627_s0 }
  0x56   : > { %s2935_s4 = sld [smem:[#allocation6 + %s2667_s24]]  ;;  %p2953_p11 = por %p217_p8, %p142_p1 }
  0x57   : > { %s2938_s3 = sld [smem:[#allocation5 + %s4601_s27]]  ;;  %p2959_p13 = por %p223_p10, %p2799_p2 }
  0x58   : > { %s2943_s18 = sld [smem:[#allocation6 + %s4601_s27]]  ;;  %p2507_p4 = pneg %p2915_p9 }
  0x59   : > { %s2070_s10 = sshll.u32 %s302_s16, 5  ;;  %s4451_s5 = sld [smem:[#allocation50_spill]] }
  0x5b   : > { %s2069_s11 = sshll.u32 %s303_s2, 1 }
  0x5c   : > { %s308_s14 = sadd.s32 %s2070_s10, %s2069_s11  ;;  %s4454_s11 = sand.u32 1, %s2659_s22  }
  0x5d   : > { %s2071_s15 = sshll.u32 %s308_s14, 3  ;;  %s205_s10 = ssub.s32 %s2932_s26, %s2938_s3 }
  0x5e   : > { %s295_s14 = scalar_lea.sflag [#allocation8], %s4454_s11 }
  0x5f   : > { %s310_s23 = scalar_lea.hbm %s4451_s5, %s2071_s15  ;;  %s2510_s28 = scalar_lea.hbm %s4451_s5, 1024 }
  0x60   : > { %s311_s6 = sshll.u32 %s310_s23, 4  ;;  %s312_s6 = int_to_ptr.hbm [resolvable:$true] %s311_s6 }
  0x61   : > { %s2503_s0 = sshra.s32 %s312_s6, 4  ;;  %s2504_s0 = int_to_ptr.hbm [resolvable:$true] %s2503_s0 }
  0x62   : > { %s2505_s27 = scalar_lea.hbm %s2504_s0, 256  ;;  %p2511_p2 = scmp.lt.s32.totalorder %s2504_s0, %s4451_s5 }
  0x63   : > { %p2506_p0 = scmp.ne.s32.totalorder %s2504_s0, %s2505_s27  ;;  %p2512_p8 = scmp.lt.s32.totalorder %s2510_s28, %s2505_s27 }
  0x65   : > { %p2508_p1 = pnand %p2507_p4, %p2506_p0  ;;  %p2513_p10 = por %p2512_p8, %p2511_p2 }
  0x67   : > { %p2509_p5 = pneg %p2508_p1 }
  0x69   : > { %p2514_p7 = pnand %p2513_p10, %p2509_p5 }
  0x6b   : > { %2517 = shalt.err (!%p2514_p7)
}
  0x6c   : > { %s4455_s3 = smov 16   ;;  %s4456_s26 = smov 256  }
  0x6d   : > { %2185 = dma.hbm_to_vmem [thread:$0]  (!%p2915_p9), %s312_s6, 4096, %s314_s9, %s295_s14, %s4456_s26, %s4456_s26, %s4455_s3  }
  0x6e   : > { %s206_s27 = ssub.s32 %s2935_s4, %s2943_s18  ;;  %s210_s11 = sadd.s32 1, %s2635_s17 }
  0x6f   : > { %s207_s20 = sor.u32 %s206_s27, %s205_s10  ;;  %s354_s0 = sand.u32 1, %s2635_s17  }
  0x70   : > { %p208_p7 = scmp.eq.s32.totalorder %s207_s20, 0  ;;  %p4457_p0 = scmp.lt.s32.totalorder %s2671_s25, 4 }
  0x71   : > { %s2170_s15 = scalar_select %p2953_p11, [#allocation5], [#allocation16] }
  0x72   : > { %s2987_s29 = scalar_select %p208_p7, %s2635_s17, %s210_s11  }
  0x73   : > { %s2171_s28 = scalar_select %p2953_p11, %s2667_s24, 0 }
  0x74   : > { %s4615_s15 = smov (!%p4457_p0, %s2170_s15), [#allocation22]  ;;  %p4458_p4 = pmov %p4457_p0 }
  0x75   : > { %s2172_s23 = scalar_select %p2953_p11, [#allocation6], [#allocation17] }
  0x76   : > { %s4617_s28 = smov (!%p4458_p4, %s2171_s28), 0  ;;  %s2076_s8 = sshll.u32 %s354_s0, 8 }
  0x77   : > { %s360_s5 = sld [smem:[%s4615_s15 + %s4617_s28]]  ;;  %p4459_p9 = pmov %p4457_p0 }
  0x78   : > { %p4460_p1 = pmov %p4457_p0  ;;  %s356_s4 = scalar_lea.vmem [#allocation11], %s2076_s8 }
  0x79   : > { %s4619_s23 = smov (!%p4459_p9, %s2172_s23), [#allocation23]  ;;  %s371_s10 = sshll.u32 %s356_s4, 4  ;;  %s372_s10 = int_to_ptr.vmem [resolvable:$true] %s371_s10 }
  0x7a   : > { %p3004_p5 = pnand %p4460_p1, %p2953_p11  ;;  %s361_s18 = sld [smem:[%s4619_s23 + %s4617_s28]] }
  0x7b   : > { %s2540_s23 = scalar_lea.hbm %s4399_s7, 1024 }
  0x7c   : > { %p2537_p2 = pneg %p3004_p5 }
  0x7d   : > { %s2078_s9 = sshll.u32 %s360_s5, 5 }
  0x80   : > { %s2077_s14 = sshll.u32 %s361_s18, 5 }
  0x81   : > { %s366_s3 = sadd.s32 %s2078_s9, %s2077_s14 }
  0x82   : > { %s2079_s26 = sshll.u32 %s366_s3, 3 }
  0x83   : > { %s368_s11 = scalar_lea.hbm %s4399_s7, %s2079_s26 }
  0x84   : > { %s369_s0 = sshll.u32 %s368_s11, 4  ;;  %s370_s0 = int_to_ptr.hbm [resolvable:$true] %s369_s0 }
  0x85   : > { %s2533_s16 = sshra.s32 %s370_s0, 4  ;;  %s2534_s16 = int_to_ptr.hbm [resolvable:$true] %s2533_s16 }
  0x86   : > { %s2535_s15 = scalar_lea.hbm %s2534_s16, 256  ;;  %p2541_p7 = scmp.lt.s32.totalorder %s2534_s16, %s4399_s7 }
  0x87   : > { %p2536_p11 = scmp.ne.s32.totalorder %s2534_s16, %s2535_s15  ;;  %p2542_p0 = scmp.lt.s32.totalorder %s2540_s23, %s2535_s15 }
  0x89   : > { %p2538_p8 = pnand %p2537_p2, %p2536_p11  ;;  %p2543_p4 = por %p2542_p0, %p2541_p7 }
  0x8b   : > { %p2539_p10 = pneg %p2538_p8 }
  0x8d   : > { %p2544_p9 = pnand %p2543_p4, %p2539_p10 }
  0x8f   : > { %2547 = shalt.err (!%p2544_p9)
}
  0x90   : > { %s2678_s9 = smov 128   ;;  %s2679_s4 = smov 8  }
  0x91   : > { %2199 = dma.hbm_to_vmem [thread:$0]  (!%p3004_p5), %s370_s0, 4096, %s372_s10, %s2876_s19, %s2678_s9, %s2678_s9, %s2679_s4  }
  0x92   : > { %383 = sbr.rel (%p2857_p12) target bundleno = 738 (0x2e2), region = 40  ;;  %s385_s14 = sand.u32 (!%p2857_p12), 1, %s2655_s21  }
  0x93   : > { %s2081_s3 = sshll.u32 (!%p2857_p12), %s385_s14, 8  ;;  %s386_s26 = scalar_lea.sflag (!%p2857_p12), [#allocation8], %s385_s14 }
  0x94   : > { %s3025_s27 = scalar_lea.vmem (!%p2857_p12), [#allocation7], %s2081_s3 }
  0x97   : > { %2614 = dma.done.wait (%p2905_p3), %s386_s26, 4096  }
  0x98   : > { %2616 = vsyncadd (%p2905_p3), %s386_s26, 4294963200  ;;  %s4462_s20 = sadd.s32 4294967295, %s2671_s25   ;;  %s4463_s11 = sld [smem:[#allocation28_spill]] }
  0x99   : > { %s395_s19 = sand.u32 1, %s4462_s20  }
  0x9a   : > { %s396_s0 = scalar_lea.sflag [#allocation10], %s395_s19 }
  0x9e   : > { %s397_s10 = sand.u32 1, %s4463_s11  }
  0x9f   : > { %s2082_s30 = sshll.u32 %s397_s10, 8 }
  0xa0   : > { %s3034_s16 = scalar_lea.vmem [#allocation9], %s2082_s30 }
  0xa1   : > { %2618 = dma.done.wait (%p2821_p6), %s396_s0, 4096  }
  0xa2   : > { %2620 = vsyncadd (%p2821_p6), %s396_s0, 4294963200  ;;  %s407_s15 = sand.u32 1, %s2631_s1  }
  0xa3   : > { %s2083_s12 = sshll.u32 %s407_s15, 8 }
  0xa4   : > { %s3041_s5 = scalar_lea.vmem [#allocation11], %s2083_s12 }
  0xa5   : > { %2622 = dma.done.wait (%p2959_p13), %s396_s0, 4096  }
  0xa6   : > { %2624 = vsyncadd (%p2959_p13), %s396_s0, 4294963200  ;;  %s4465_s28 = sld [smem:[#allocation30_spill]] }
  0xa7   : > { %s4466_s9 = sld [smem:[#allocation48_spill]] }
  0xac   : > { %p463_p12 = scmp.lt.s32.totalorder %s4465_s28, 3  ;;  %p500_p3 = scmp.eq.s32.totalorder %s4465_s28, 0 }
  0xad   : > { %v2680_v0 = vmov (%p500_p3), 0.0  }
  0xae   : > { %s4621_s28 = smov (!%p463_p12, %s4465_s28), 3  ;;  %505 = sbr.rel (!%p500_p3) target bundleno = 190 (0xbe), region = 56  ;;  %506 = vst [vmem:[#allocation2 + $0x30] sm:$0xff] (%p500_p3), %v2680_v0 }
  0xaf   : > { %s2125_s23 = sshll.u32 %s4621_s28, 7  ;;  %507 = vst [vmem:[#allocation2] sm:$0xff] (%p500_p3), %v2680_v0 }
  0xb0   : > { %s3053_s4 = scalar_lea.vmem %s4466_s9, %s2125_s23  ;;  %508 = vst [vmem:[#allocation2 + $0x58] sm:$0xff] (%p500_p3), %v2680_v0 }
  0xb1   : > { %509 = vst [vmem:[#allocation2 + $0x18] sm:$0xff] (%p500_p3), %v2680_v0 }
  0xb2   : > { %510 = vst [vmem:[#allocation2 + $0x50] sm:$0xff] (%p500_p3), %v2680_v0 }
  0xb3   : > { %511 = vst [vmem:[#allocation2 + $0x68] sm:$0xff] %v2680_v0 }
  0xb4   : > { %512 = vst [vmem:[#allocation2 + $0x8] sm:$0xff] %v2680_v0 }
  0xb5   : > { %513 = vst [vmem:[#allocation2 + $0x48] sm:$0xff] %v2680_v0 }
  0xb6   : > { %514 = vst [vmem:[#allocation2 + $0x40] sm:$0xff] %v2680_v0 }
  0xb7   : > { %515 = vst [vmem:[#allocation2 + $0x20] sm:$0xff] %v2680_v0 }
  0xb8   : > { %516 = vst [vmem:[#allocation2 + $0x10] sm:$0xff] %v2680_v0 }
  0xb9   : > { %517 = vst [vmem:[#allocation2 + $0x38] sm:$0xff] %v2680_v0 }
  0xba   : > { %518 = vst [vmem:[#allocation2 + $0x60] sm:$0xff] %v2680_v0 }
  0xbb   : > { %519 = vst [vmem:[#allocation2 + $0x70] sm:$0xff] %v2680_v0 }
  0xbc   : > { %520 = vst [vmem:[#allocation2 + $0x78] sm:$0xff] %v2680_v0 }
  0xbd   : > { %521 = vst [vmem:[#allocation2 + $0x28] sm:$0xff] %v2680_v0 }
  0xbe PF: > { %s4467_s2 = sld [smem:[#allocation30_spill]] }
  0xc4   : > { %s524_s14 = sld [smem:[#allocation4 + %s4467_s2]] }
  0xca   : > { %p2087_p6 = scmp.le.s32.totalorder %s524_s14, 0 }
  0xcc   : > { %528 = sbr.rel (%p2087_p6) target bundleno = 709 (0x2c5), region = 60 }
  0xd1   : > { %v575_v1 = vld [vmem:[%s3025_s27 + $0xf0] sm:$0xff]  ;;  %v576_v2 = vld [vmem:[%s3025_s27 + $0xf8] sm:$0xff]  ;;  %v573_v3 = vld [vmem:[%s3025_s27 + $0xe0] sm:$0xff]  ;;  %s4468_s20 = sld [smem:[#allocation49_spill]] }
  0xd2   : > { %2128 = vmatpush.msra.mxu2 %v575_v1  ;;  %2144 = vmatpush.msra.mxu3 %v576_v2  ;;  %v574_v4 = vld [vmem:[%s3025_s27 + $0xe8] sm:$0xff]  ;;  %v571_v5 = vld [vmem:[%s3025_s27 + $0xd0] sm:$0xff]  ;;  %v572_v6 = vld [vmem:[%s3025_s27 + $0xd8] sm:$0xff] }
  0xd3   : > { %577 = vmatpush.msra.mxu0 %v575_v1  ;;  %642 = vmatpush.msra.mxu1 %v576_v2  ;;  %v569_v7 = vld [vmem:[%s3025_s27 + $0xc0] sm:$0xff]  ;;  %v570_v8 = vld [vmem:[%s3025_s27 + $0xc8] sm:$0xff]  ;;  %v567_v9 = vld [vmem:[%s3025_s27 + $0xb0] sm:$0xff] }
  0xd4   : > { %2129 = vmatpush.msra.mxu2 %v573_v3  ;;  %2145 = vmatpush.msra.mxu3 %v574_v4  ;;  %v568_v10 = vld [vmem:[%s3025_s27 + $0xb8] sm:$0xff]  ;;  %v565_v11 = vld [vmem:[%s3025_s27 + $0xa0] sm:$0xff]  ;;  %v566_v12 = vld [vmem:[%s3025_s27 + $0xa8] sm:$0xff] }
  0xd5   : > { %578 = vmatpush.msra.mxu0 %v573_v3  ;;  %643 = vmatpush.msra.mxu1 %v574_v4  ;;  %v563_v13 = vld [vmem:[%s3025_s27 + $0x90] sm:$0xff]  ;;  %v564_v14 = vld [vmem:[%s3025_s27 + $0x98] sm:$0xff]  ;;  %v561_v15 = vld [vmem:[%s3025_s27 + $0x80] sm:$0xff] }
  0xd6   : > { %2130 = vmatpush.msra.mxu2 %v571_v5  ;;  %2146 = vmatpush.msra.mxu3 %v572_v6  ;;  %v562_v16 = vld [vmem:[%s3025_s27 + $0x88] sm:$0xff]  ;;  %v559_v17 = vld [vmem:[%s3025_s27 + $0x70] sm:$0xff]  ;;  %v560_v18 = vld [vmem:[%s3025_s27 + $0x78] sm:$0xff] }
  0xd7   : > { %579 = vmatpush.msra.mxu0 %v571_v5  ;;  %644 = vmatpush.msra.mxu1 %v572_v6  ;;  %v557_v19 = vld [vmem:[%s3025_s27 + $0x60] sm:$0xff]  ;;  %v558_v20 = vld [vmem:[%s3025_s27 + $0x68] sm:$0xff]  ;;  %v555_v21 = vld [vmem:[%s3025_s27 + $0x50] sm:$0xff]  ;;  %s4469_s11 = smov %s4468_s20 }
  0xd8   : > { %2131 = vmatpush.msra.mxu2 %v569_v7  ;;  %2147 = vmatpush.msra.mxu3 %v570_v8  ;;  %v556_v22 = vld [vmem:[%s3025_s27 + $0x58] sm:$0xff]  ;;  %v553_v23 = vld [vmem:[%s3025_s27 + $0x40] sm:$0xff]  ;;  %v554_v24 = vld [vmem:[%s3025_s27 + $0x48] sm:$0xff] }
  0xd9   : > { %580 = vmatpush.msra.mxu0 %v569_v7  ;;  %645 = vmatpush.msra.mxu1 %v570_v8  ;;  %v551_v25 = vld [vmem:[%s3025_s27 + $0x30] sm:$0xff]  ;;  %v552_v26 = vld [vmem:[%s3025_s27 + $0x38] sm:$0xff]  ;;  %v549_v27 = vld [vmem:[%s3025_s27 + $0x20] sm:$0xff] }
  0xda   : > { %2132 = vmatpush.msra.mxu2 %v567_v9  ;;  %2148 = vmatpush.msra.mxu3 %v568_v10  ;;  %v550_v28 = vld [vmem:[%s3025_s27 + $0x28] sm:$0xff]  ;;  %v547_v29 = vld [vmem:[%s3025_s27 + $0x10] sm:$0xff]  ;;  %v548_v30 = vld [vmem:[%s3025_s27 + $0x18] sm:$0xff] }
  0xdb   : > { %581 = vmatpush.msra.mxu0 %v567_v9  ;;  %646 = vmatpush.msra.mxu1 %v568_v10  ;;  %v545_v31 = vld [vmem:[%s3025_s27] sm:$0xff]  ;;  %v546_v32 = vld [vmem:[%s3025_s27 + $0x8] sm:$0xff]  ;;  %v737_v34 = vld [vmem:[%s3034_s16 + $0xf0] sm:$0xff] }
  0xdc   : > { %2133 = vmatpush.msra.mxu2 %v565_v11  ;;  %2149 = vmatpush.msra.mxu3 %v566_v12  ;;  %v3091_v33 = vld [vmem:[%s4468_s20 + $0x40] sm:$0xff]  ;;  %v738_v35 = vld [vmem:[%s3034_s16 + $0xf8] sm:$0xff]  ;;  %v736_v37 = vld [vmem:[%s3034_s16 + $0xe8] sm:$0xff] }
  0xdd   : > { %582 = vmatpush.msra.mxu0 %v565_v11  ;;  %647 = vmatpush.msra.mxu1 %v566_v12  ;;  %v735_v36 = vld [vmem:[%s3034_s16 + $0xe0] sm:$0xff]  ;;  %v733_v39 = vld [vmem:[%s3034_s16 + $0xd0] sm:$0xff]  ;;  %v734_v40 = vld [vmem:[%s3034_s16 + $0xd8] sm:$0xff] }
  0xde   : > { %2134 = vmatpush.msra.mxu2 %v563_v13  ;;  %2150 = vmatpush.msra.mxu3 %v564_v14  ;;  %v3102_v38 = vld [vmem:[%s4469_s11] sm:$0xff]  ;;  %v732_v42 = vld [vmem:[%s3034_s16 + $0xc8] sm:$0xff]  ;;  %v729_v44 = vld [vmem:[%s3034_s16 + $0xb0] sm:$0xff] }
  0xdf   : > { %583 = vmatpush.msra.mxu0 %v563_v13  ;;  %648 = vmatpush.msra.mxu1 %v564_v14  ;;  %v731_v41 = vld [vmem:[%s3034_s16 + $0xc0] sm:$0xff]  ;;  %v3113_v43 = vld [vmem:[%s4469_s11 + $0x48] sm:$0xff]  ;;  %v730_v45 = vld [vmem:[%s3034_s16 + $0xb8] sm:$0xff] }
  0xe0   : > { %2135 = vmatpush.msra.mxu2 %v561_v15  ;;  %2151 = vmatpush.msra.mxu3 %v562_v16  ;;  %v727_v46 = vld [vmem:[%s3034_s16 + $0xa0] sm:$0xff]  ;;  %v728_v47 = vld [vmem:[%s3034_s16 + $0xa8] sm:$0xff]  ;;  %v725_v49 = vld [vmem:[%s3034_s16 + $0x90] sm:$0xff] }
  0xe1   : > { %584 = vmatpush.msra.mxu0 %v561_v15  ;;  %649 = vmatpush.msra.mxu1 %v562_v16  ;;  %v3124_v48 = vld [vmem:[%s4469_s11 + $0x8] sm:$0xff]  ;;  %v726_v50 = vld [vmem:[%s3034_s16 + $0x98] sm:$0xff]  ;;  %v723_v51 = vld [vmem:[%s3034_s16 + $0x80] sm:$0xff] }
  0xe2   : > { %2136 = vmatpush.msra.mxu2 %v559_v17  ;;  %2152 = vmatpush.msra.mxu3 %v560_v18  ;;  %v724_v52 = vld [vmem:[%s3034_s16 + $0x88] sm:$0xff]  ;;  %v3135_v53 = vld [vmem:[%s4469_s11 + $0x50] sm:$0xff]  ;;  %v722_v55 = vld [vmem:[%s3034_s16 + $0x78] sm:$0xff] }
  0xe3   : > { %585 = vmatpush.msra.mxu0 %v559_v17  ;;  %650 = vmatpush.msra.mxu1 %v560_v18  ;;  %v721_v54 = vld [vmem:[%s3034_s16 + $0x70] sm:$0xff]  ;;  %v719_v56 = vld [vmem:[%s3034_s16 + $0x60] sm:$0xff]  ;;  %v720_v57 = vld [vmem:[%s3034_s16 + $0x68] sm:$0xff] }
  0xe4   : > { %2137 = vmatpush.msra.mxu2 %v557_v19  ;;  %2153 = vmatpush.msra.mxu3 %v558_v20  ;;  %v3146_v58 = vld [vmem:[%s4469_s11 + $0x10] sm:$0xff]  ;;  %v718_v60 = vld [vmem:[%s3034_s16 + $0x58] sm:$0xff]  ;;  %v715_v61 = vld [vmem:[%s3034_s16 + $0x40] sm:$0xff] }
  0xe5   : > { %586 = vmatpush.msra.mxu0 %v557_v19  ;;  %651 = vmatpush.msra.mxu1 %v558_v20  ;;  %v717_v59 = vld [vmem:[%s3034_s16 + $0x50] sm:$0xff]  ;;  %v716_v62 = vld [vmem:[%s3034_s16 + $0x48] sm:$0xff]  ;;  %v3157_v63 = vld [vmem:[%s4469_s11 + $0x58] sm:$0xff] }
  0xe6   : > { %2138 = vmatpush.msra.mxu2 %v555_v21  ;;  %2154 = vmatpush.msra.mxu3 %v556_v22  ;;  %v713_v0 = vld [vmem:[%s3034_s16 + $0x30] sm:$0xff]  ;;  %v714_v1 = vld [vmem:[%s3034_s16 + $0x38] sm:$0xff]  ;;  %v711_v2 = vld [vmem:[%s3034_s16 + $0x20] sm:$0xff] }
  0xe7   : > { %587 = vmatpush.msra.mxu0 %v555_v21  ;;  %652 = vmatpush.msra.mxu1 %v556_v22  ;;  %v712_v3 = vld [vmem:[%s3034_s16 + $0x28] sm:$0xff]  ;;  %v532_v4 = vld [vmem:[%s4469_s11 + $0x18] sm:$0xff]  ;;  %v709_v5 = vld [vmem:[%s3034_s16 + $0x10] sm:$0xff] }
  0xe8   : > { %2139 = vmatpush.msra.mxu2 %v553_v23  ;;  %2155 = vmatpush.msra.mxu3 %v554_v24  ;;  %v710_v6 = vld [vmem:[%s3034_s16 + $0x18] sm:$0xff]  ;;  %v707_v7 = vld [vmem:[%s3034_s16] sm:$0xff]  ;;  %v708_v8 = vld [vmem:[%s3034_s16 + $0x8] sm:$0xff] }
  0xe9   : > { %588 = vmatpush.msra.mxu0 %v553_v23  ;;  %653 = vmatpush.msra.mxu1 %v554_v24  ;;  %v3175_v9 = vld [vmem:[%s4469_s11 + $0x60] sm:$0xff]  ;;  %v3185_v11 = vld [vmem:[%s4469_s11 + $0x68] sm:$0xff]  ;;  %v3195_v13 = vld [vmem:[%s4469_s11 + $0x70] sm:$0xff] }
  0xea   : > { %2140 = vmatpush.msra.mxu2 %v551_v25  ;;  %2156 = vmatpush.msra.mxu3 %v552_v26  ;;  %v533_v10 = vld [vmem:[%s4469_s11 + $0x20] sm:$0xff]  ;;  %v534_v12 = vld [vmem:[%s4469_s11 + $0x28] sm:$0xff]  ;;  %v535_v14 = vld [vmem:[%s4469_s11 + $0x30] sm:$0xff] }
  0xeb   : > { %589 = vmatpush.msra.mxu0 %v551_v25  ;;  %654 = vmatpush.msra.mxu1 %v552_v26  ;;  %v3205_v15 = vld [vmem:[%s4469_s11 + $0x78] sm:$0xff]  ;;  %v1555_v19 = vld [vmem:[%s3041_s5 + $0x70] sm:$0xff]  ;;  %v1554_v23 = vld [vmem:[%s3041_s5 + $0x68] sm:$0xff] }
  0xec   : > { %2141 = vmatpush.msra.mxu2 %v549_v27  ;;  %2157 = vmatpush.msra.mxu3 %v550_v28  ;;  %v536_v16 = vld [vmem:[%s4469_s11 + $0x38] sm:$0xff]  ;;  %v1571_v20 = vld [vmem:[%s3041_s5 + $0xf0] sm:$0xff]  ;;  %v1570_v24 = vld [vmem:[%s3041_s5 + $0xe8] sm:$0xff] }
  0xed   : > { %590 = vmatpush.msra.mxu0 %v549_v27  ;;  %655 = vmatpush.msra.mxu1 %v550_v28  ;;  %v1556_v17 = vld [vmem:[%s3041_s5 + $0x78] sm:$0xff]  ;;  %v1553_v25 = vld [vmem:[%s3041_s5 + $0x60] sm:$0xff] }
  0xee   : > { %2142 = vmatpush.msra.mxu2 %v547_v29  ;;  %2158 = vmatpush.msra.mxu3 %v548_v30  ;;  %v1572_v18 = vld [vmem:[%s3041_s5 + $0xf8] sm:$0xff]  ;;  %v1569_v26 = vld [vmem:[%s3041_s5 + $0xe0] sm:$0xff] }
  0xef   : > { %591 = vmatpush.msra.mxu0 %v547_v29  ;;  %656 = vmatpush.msra.mxu1 %v548_v30  ;;  %v1552_v29 = vld [vmem:[%s3041_s5 + $0x58] sm:$0xff] }
  0xf0   : > { %2143 = vmatpush.msra.mxu2 %v545_v31  ;;  %2159 = vmatpush.msra.mxu3 %v546_v32  ;;  %v1568_v30 = vld [vmem:[%s3041_s5 + $0xd8] sm:$0xff] }
  0xf1   : > { %617 = vmatmul.f32.vlgmr.msra.gmra.mxu2 %v3091_v33  ;;  %682 = vmatmul.f32.vlgmr.msra.gmra.mxu3 %v3091_v33 }
  0xf2   : > { %739 = vmatpush.msrb.mxu2 %v737_v34  ;;  %804 = vmatpush.msrb.mxu3 %v738_v35  ;;  %v1550_v35 = vld [vmem:[%s3041_s5 + $0x48] sm:$0xff] }
  0xf3   : > { %592 = vmatpush.msra.mxu0 %v545_v31  ;;  %657 = vmatpush.msra.mxu1 %v546_v32  ;;  %v1551_v31 = vld [vmem:[%s3041_s5 + $0x50] sm:$0xff] }
  0xf4   : > { %740 = vmatpush.msrb.mxu2 %v735_v36  ;;  %805 = vmatpush.msrb.mxu3 %v736_v37  ;;  %v1567_v32 = vld [vmem:[%s3041_s5 + $0xd0] sm:$0xff]  ;;  %v1566_v36 = vld [vmem:[%s3041_s5 + $0xc8] sm:$0xff] }
  0xf5   : > { %593 = vmatmul.f32.vlgmr.msra.gmra.mxu0 %v3102_v38  ;;  %658 = vmatmul.f32.vlgmr.msra.gmra.mxu1 %v3102_v38 }
  0xf6   : > { %741 = vmatpush.msrb.mxu2 %v733_v39  ;;  %806 = vmatpush.msrb.mxu3 %v734_v40  ;;  %v1549_v39 = vld [vmem:[%s3041_s5 + $0x40] sm:$0xff] }
  0xf7   : > { %1573 = vmatpush.msrb.mxu0 %v1556_v17  ;;  %1638 = vmatpush.msrb.mxu1 %v1572_v18  ;;  %v1565_v40 = vld [vmem:[%s3041_s5 + $0xc0] sm:$0xff] }
  0xf8   : > { %742 = vmatpush.msrb.mxu2 %v731_v41  ;;  %807 = vmatpush.msrb.mxu3 %v732_v42 }
  0xf9   : > { %620 = vmatmul.f32.gmra.mxu2 %v3113_v43  ;;  %685 = vmatmul.f32.gmra.mxu3 %v3113_v43 }
  0xfa   : > { %743 = vmatpush.msrb.mxu2 %v729_v44  ;;  %808 = vmatpush.msrb.mxu3 %v730_v45  ;;  %v1548_v45 = vld [vmem:[%s3041_s5 + $0x38] sm:$0xff] }
  0xfb   : > { %1574 = vmatpush.msrb.mxu0 %v1555_v19  ;;  %1639 = vmatpush.msrb.mxu1 %v1571_v20  ;;  %v1543_v19 = vld [vmem:[%s3041_s5 + $0x10] sm:$0xff] }
  0xfc   : > { %744 = vmatpush.msrb.mxu2 %v727_v46  ;;  %809 = vmatpush.msrb.mxu3 %v728_v47  ;;  %v1564_v46 = vld [vmem:[%s3041_s5 + $0xb8] sm:$0xff]  ;;  %v1559_v20 = vld [vmem:[%s3041_s5 + $0x90] sm:$0xff] }
  0xfd   : > { %596 = vmatmul.f32.gmra.mxu0 %v3124_v48  ;;  %661 = vmatmul.f32.gmra.mxu1 %v3124_v48 }
  0xfe   : > { %745 = vmatpush.msrb.mxu2 %v725_v49  ;;  %810 = vmatpush.msrb.mxu3 %v726_v50  ;;  %v1547_v49 = vld [vmem:[%s3041_s5 + $0x30] sm:$0xff] }
  0xff   : > { %1575 = vmatpush.msrb.mxu0 %v1554_v23  ;;  %1640 = vmatpush.msrb.mxu1 %v1570_v24  ;;  %v1563_v50 = vld [vmem:[%s3041_s5 + $0xb0] sm:$0xff] }
 0x100   : > { %746 = vmatpush.msrb.mxu2 %v723_v51  ;;  %811 = vmatpush.msrb.mxu3 %v724_v52 }
 0x101   : > { %623 = vmatmul.f32.gmra.mxu2 %v3135_v53  ;;  %688 = vmatmul.f32.gmra.mxu3 %v3135_v53 }
 0x102   : > { %747 = vmatpush.msrb.mxu2 %v721_v54  ;;  %812 = vmatpush.msrb.mxu3 %v722_v55 }
 0x103   : > { %1576 = vmatpush.msrb.mxu0 %v1553_v25  ;;  %1641 = vmatpush.msrb.mxu1 %v1569_v26 }
 0x104   : > { %748 = vmatpush.msrb.mxu2 %v719_v56  ;;  %813 = vmatpush.msrb.mxu3 %v720_v57  ;;  %v1546_v56 = vld [vmem:[%s3041_s5 + $0x28] sm:$0xff] }
 0x105   : > { %599 = vmatmul.f32.gmra.mxu0 %v3146_v58  ;;  %664 = vmatmul.f32.gmra.mxu1 %v3146_v58  ;;  %v1562_v57 = vld [vmem:[%s3041_s5 + $0xa8] sm:$0xff] }
 0x106   : > { %749 = vmatpush.msrb.mxu2 %v717_v59  ;;  %814 = vmatpush.msrb.mxu3 %v718_v60 }
 0x107   : > { %1577 = vmatpush.msrb.mxu0 %v1552_v29  ;;  %1642 = vmatpush.msrb.mxu1 %v1568_v30 }
 0x108   : > { %750 = vmatpush.msrb.mxu2 %v715_v61  ;;  %815 = vmatpush.msrb.mxu3 %v716_v62 }
 0x109   : > { %626 = vmatmul.f32.gmra.mxu2 %v3157_v63  ;;  %691 = vmatmul.f32.gmra.mxu3 %v3157_v63 }
 0x10a   : > { %751 = vmatpush.msrb.mxu2 %v713_v0  ;;  %816 = vmatpush.msrb.mxu3 %v714_v1  ;;  %v1561_v0 = vld [vmem:[%s3041_s5 + $0xa0] sm:$0xff] }
 0x10b   : > { %1578 = vmatpush.msrb.mxu0 %v1551_v31  ;;  %1643 = vmatpush.msrb.mxu1 %v1567_v32 }
 0x10c   : > { %752 = vmatpush.msrb.mxu2 %v711_v2  ;;  %817 = vmatpush.msrb.mxu3 %v712_v3 }
 0x10d   : > { %602 = vmatmul.f32.gmra.mxu0 %v532_v4  ;;  %667 = vmatmul.f32.gmra.mxu1 %v532_v4 }
 0x10e   : > { %753 = vmatpush.msrb.mxu2 %v709_v5  ;;  %818 = vmatpush.msrb.mxu3 %v710_v6 }
 0x10f   : > { %1579 = vmatpush.msrb.mxu0 %v1550_v35  ;;  %1644 = vmatpush.msrb.mxu1 %v1566_v36 }
 0x110   : > { %754 = vmatpush.msrb.mxu2 %v707_v7  ;;  %819 = vmatpush.msrb.mxu3 %v708_v8 }
 0x111   : > { %629 = vmatmul.f32.gmra.mxu2 %v3175_v9  ;;  %694 = vmatmul.f32.gmra.mxu3 %v3175_v9 }
 0x112   : > { %1580 = vmatpush.msrb.mxu0 %v1549_v39  ;;  %1645 = vmatpush.msrb.mxu1 %v1565_v40 }
 0x114   : > { %1581 = vmatpush.msrb.mxu0 %v1548_v45  ;;  %1646 = vmatpush.msrb.mxu1 %v1564_v46 }
 0x115   : > { %605 = vmatmul.f32.gmra.mxu0 %v533_v10  ;;  %670 = vmatmul.f32.gmra.mxu1 %v533_v10 }
 0x116   : > { %1582 = vmatpush.msrb.mxu0 %v1547_v49  ;;  %1647 = vmatpush.msrb.mxu1 %v1563_v50  ;;  %v1558_v49 = vld [vmem:[%s3041_s5 + $0x88] sm:$0xff] }
 0x118   : > { %1583 = vmatpush.msrb.mxu0 %v1546_v56  ;;  %1648 = vmatpush.msrb.mxu1 %v1562_v57 }
 0x119   : > { %632 = vmatmul.f32.gmra.mxu2 %v3185_v11  ;;  %697 = vmatmul.f32.gmra.mxu3 %v3185_v11 }
 0x11a   : > { %1649 = vmatpush.msrb.mxu1 %v1561_v0 }
 0x11d   : > { %608 = vmatmul.f32.gmra.mxu0 %v534_v12  ;;  %673 = vmatmul.f32.gmra.mxu1 %v534_v12 }
 0x121   : > { %635 = vmatmul.f32.gmra.mxu2 %v3195_v13  ;;  %700 = vmatmul.f32.gmra.mxu3 %v3195_v13 }
 0x125   : > { %611 = vmatmul.f32.gmra.mxu0 %v535_v14  ;;  %676 = vmatmul.f32.gmra.mxu1 %v535_v14 }
 0x129   : > { %638 = vmatmul.f32.gmra.mxu2 %v3205_v15  ;;  %703 = vmatmul.f32.gmra.mxu3 %v3205_v15 }
 0x12d   : > { %614 = vmatmul.f32.gmra.mxu0 %v536_v16  ;;  %679 = vmatmul.f32.gmra.mxu1 %v536_v16 }
 0x131   : > { %755 = vmatmul.f32.vlgmr.msrb.gmra.mxu2 %v3102_v38  ;;  %820 = vmatmul.f32.vlgmr.msrb.gmra.mxu3 %v3102_v38 }
 0x139   : > { %758 = vmatmul.f32.gmra.mxu2 %v3124_v48  ;;  %823 = vmatmul.f32.gmra.mxu3 %v3124_v48 }
 0x141   : > { %761 = vmatmul.f32.gmra.mxu2 %v3146_v58  ;;  %826 = vmatmul.f32.gmra.mxu3 %v3146_v58 }
 0x149   : > { %764 = vmatmul.f32.gmra.mxu2 %v532_v4  ;;  %829 = vmatmul.f32.gmra.mxu3 %v532_v4 }
 0x151   : > { %767 = vmatmul.f32.gmra.mxu2 %v533_v10  ;;  %832 = vmatmul.f32.gmra.mxu3 %v533_v10 }
 0x159   : > { %770 = vmatmul.f32.gmra.mxu2 %v534_v12  ;;  %835 = vmatmul.f32.gmra.mxu3 %v534_v12  ;;  %v1544_v12 = vld [vmem:[%s3041_s5 + $0x18] sm:$0xff] }
 0x161   : > { %773 = vmatmul.f32.gmra.mxu2 %v535_v14  ;;  %838 = vmatmul.f32.gmra.mxu3 %v535_v14 }
 0x169   : > { %776 = vmatmul.f32.gmra.mxu2 %v536_v16  ;;  %841 = vmatmul.f32.gmra.mxu3 %v536_v16 }
 0x171   : > { %779 = vmatmul.f32.gmra.mxu2 %v3091_v33  ;;  %844 = vmatmul.f32.gmra.mxu3 %v3091_v33 }
 0x172   : > { %v3262_v41 = vpop.f32.mrf.mxu0  ;;  %v3266_v42 = vpop.f32.mrf.mxu1 }
 0x173   : > { %v2088_v47 = vmul.f32 -1.442695, %v3262_v41  ;;  %v2089_v51 = vmul.f32 -1.442695, %v3266_v42 }
 0x174   : > { %v3226_v21 = vpop.f32.mrf.mxu2  ;;  %v3228_v22 = vpop.f32.mrf.mxu3 }
 0x175   : > { %4470 = vst [vmem:[#allocation35_spill] sm:$0xff] %v3226_v21  ;;  %2309 = vpow2.f32 %v2088_v47  ;;  %v2105_v25 = vmul.f32 -1.442695, %v3228_v22  ;;  %v1542_v47 = vld [vmem:[%s3041_s5 + $0x8] sm:$0xff] }
 0x176   : > { %4471 = vst [vmem:[#allocation36_spill] sm:$0xff] %v3228_v22  ;;  %2311 = vpow2.f32 %v2089_v51 }
 0x179   : > { %782 = vmatmul.f32.gmra.mxu2 %v3113_v43  ;;  %847 = vmatmul.f32.gmra.mxu3 %v3113_v43 }
 0x17a   : > { %v3277_v48 = vpop.f32.mrf.mxu0  ;;  %v3282_v52 = vpop.f32.mrf.mxu1 }
 0x17b   : > { %v2310_v58 = vpop.eup %2309  ;;  %v2091_v59 = vmul.f32 -1.442695, %v3282_v52 }
 0x17c   : > { %v3238_v27 = vpop.f32.mrf.mxu2  ;;  %v3240_v28 = vpop.f32.mrf.mxu3  ;;  %v3294_v62 = vadd.f32 1.0, %v2310_v58 }
 0x17d   : > { %4472 = vst [vmem:[#allocation37_spill] sm:$0xff] %v3238_v27  ;;  %v2312_v61 = vpop.eup %2311 }
 0x17e   : > { %4473 = vst [vmem:[#allocation38_spill] sm:$0xff] %v3240_v28  ;;  %v3298_v1 = vadd.f32 1.0, %v2312_v61  ;;  %vm1002_vm0 = vweird.f32 %v3294_v62 }
 0x180   : > { %vm1017_vm3 = vweird.f32 %v3298_v1 }
 0x181   : > { %785 = vmatmul.f32.gmra.mxu2 %v3135_v53  ;;  %850 = vmatmul.f32.gmra.mxu3 %v3135_v53  ;;  %v2090_v53 = vmul.f32 -1.442695, %v3277_v48 }
 0x182   : > { %v3292_v60 = vpop.f32.mrf.mxu0  ;;  %v3300_v2 = vpop.f32.mrf.mxu1 }
 0x183   : > { %2313 = vpow2.f32 %v2090_v53  ;;  %v2093_v18 = vmul.f32 -1.442695, %v3300_v2 }
 0x184   : > { %v3248_v33 = vpop.f32.mrf.mxu2  ;;  %v3250_v34 = vpop.f32.mrf.mxu3  ;;  %2315 = vpow2.f32 %v2091_v59  ;;  %v1008_v59 = vand.u32 2147483648, %v3294_v62 }
 0x185   : > { %2317 = vrcp.f32 %v3294_v62 }
 0x186   : > { %2319 = vrcp.f32 %v3298_v1 }
 0x189   : > { %788 = vmatmul.f32.gmra.mxu2 %v3157_v63  ;;  %853 = vmatmul.f32.gmra.mxu3 %v3157_v63  ;;  %v1545_v63 = vld [vmem:[%s3041_s5 + $0x20] sm:$0xff]  ;;  %v2314_v3 = vpop.eup %2313 }
 0x18a   : > { %1584 = vmatpush.msrb.mxu0 %v1545_v63  ;;  %v2316_v6 = vpop.eup %2315  ;;  %v3308_v7 = vadd.f32 1.0, %v2314_v3  ;;  %v3310_v8 = vpop.f32.mrf.mxu0 }
 0x18b   : > { %v3313_v10 = vpop.eup %2317  ;;  %v3325_v17 = vpop.f32.mrf.mxu1  ;;  %v2094_v29 = vmul.f32 -1.442695, %v3310_v8 }
 0x18c   : > { %v3256_v37 = vpop.f32.mrf.mxu2  ;;  %v3258_v38 = vpop.f32.mrf.mxu3  ;;  %2321 = vrcp.f32 %v3308_v7  ;;  %v998_v16 = vmul.f32 %v3313_v10, %v3294_v62  ;;  %1585 = vmatpush.msrb.mxu0 %v1544_v12  ;;  %v2095_v45 = vmul.f32 -1.442695, %v3325_v17  ;;  %vm1003_vm1 = vweird.f32 %v3313_v10 }
 0x18d   : > { %v3320_v14 = vpop.eup %2319  ;;  %v1006_v12 = vand.u32 2147483647, %v3294_v62  ;;  %vm3377_vm2 = vmor %vm1002_vm0, %vm1003_vm1  ;;  %vm1032_vm8 = vweird.f32 %v3308_v7 }
 0x18e   : > { %1586 = vmatpush.msrb.mxu0 %v1543_v19  ;;  %v1013_v26 = vmul.f32 %v3320_v14, %v3298_v1  ;;  %v999_v31 = vsub.f32 1.0, %v998_v16  ;;  %v1557_v16 = vld [vmem:[%s3041_s5 + $0x80] sm:$0xff]  ;;  %vm1018_vm4 = vweird.f32 %v3320_v14 }
 0x18f   : > { %vm1007_vm5 = vcmp.eq.f32.partialorder %v1006_v12, 8.507059e+37  ;;  %vm3403_vm6 = vmor %vm1017_vm3, %vm1018_vm4 }
 0x190   : > { %v1014_v39 = vsub.f32 1.0, %v1013_v26  ;;  %v1000_v46 = vmul.f32 %v3313_v10, %v999_v31  ;;  %1587 = vmatpush.msrb.mxu0 %v1542_v47 }
 0x191   : > { %791 = vmatmul.f32.gmra.mxu2 %v3175_v9  ;;  %856 = vmatmul.f32.gmra.mxu3 %v3175_v9  ;;  %v2092_v9 = vmul.f32 -1.442695, %v3292_v60 }
 0x192   : > { %v3339_v30 = vpop.eup %2321  ;;  %v3341_v32 = vpop.f32.mrf.mxu0  ;;  %v1015_v61 = vmul.f32 %v3320_v14, %v1014_v39 }
 0x193   : > { %2323 = vpow2.f32 %v2092_v9  ;;  %v1028_v40 = vmul.f32 %v3339_v30, %v3308_v7  ;;  %v2096_v56 = vmul.f32 -1.442695, %v3341_v32  ;;  %v3358_v57 = vpop.f32.mrf.mxu1  ;;  %v1001_v9 = vadd.f32 %v3313_v10, %v1000_v46 }
 0x194   : > { %v3268_v43 = vpop.f32.mrf.mxu2  ;;  %v3270_v44 = vpop.f32.mrf.mxu3  ;;  %v1016_v39 = vadd.f32 %v3320_v14, %v1015_v61  ;;  %vm1033_vm9 = vweird.f32 %v3339_v30 }
 0x195   : > { %v1029_v63 = vsub.f32 1.0, %v1028_v40  ;;  %v1005_v46 = vsel %vm3377_vm2, %v3313_v10, %v1001_v9  ;;  %v2097_v10 = vmul.f32 -1.442695, %v3358_v57  ;;  %v1036_v9 = vand.u32 2147483647, %v3308_v7  ;;  %vm3432_vm10 = vmor %vm1032_vm8, %vm1033_vm9 }
 0x197   : > { %v1030_v40 = vmul.f32 %v3339_v30, %v1029_v63  ;;  %v1020_v63 = vsel %vm3403_vm6, %v3320_v14, %v1016_v39  ;;  %vm1037_vm13 = vcmp.eq.f32.partialorder %v1036_v9, 8.507059e+37 }
 0x199   : > { %794 = vmatmul.f32.gmra.mxu2 %v3185_v11  ;;  %859 = vmatmul.f32.gmra.mxu3 %v3185_v11  ;;  %v3315_v11 = vadd.f32 1.0, %v2316_v6  ;;  %v2324_v35 = vpop.eup %2323 }
 0x19a   : > { %v3351_v50 = vadd.f32 1.0, %v2324_v35  ;;  %v3388_v62 = vpop.f32.mrf.mxu0  ;;  %v1009_v35 = vor.u32 1.1754944e-38, %v1008_v59 }
 0x19b   : > { %2325 = vrcp.f32 %v3315_v11  ;;  %vm1047_vm11 = vweird.f32 %v3315_v11  ;;  %v1051_v19 = vand.u32 2147483647, %v3315_v11 }
 0x19c   : > { %v3285_v54 = vpop.f32.mrf.mxu2  ;;  %v3287_v55 = vpop.f32.mrf.mxu3  ;;  %v1010_v61 = vsel %vm1007_vm5, %v1009_v35, %v1005_v46  ;;  %vm1062_vm0 = vweird.f32 %v3351_v50 }
 0x19d   : > { %4474 = vst [vmem:[#allocation39_spill] sm:$0xff] %v3287_v55  ;;  %vm3474_vm15 = vcmp.eq.f32.partialorder %v1051_v19, 8.507059e+37 }
 0x1a1   : > { %797 = vmatmul.f32.gmra.mxu2 %v3195_v13  ;;  %862 = vmatmul.f32.gmra.mxu3 %v3195_v13  ;;  %v1560_v13 = vld [vmem:[%s3041_s5 + $0x98] sm:$0xff]  ;;  %v3343_v36 = vpop.eup %2325 }
 0x1a2   : > { %1650 = vmatpush.msrb.mxu1 %v1560_v13  ;;  %v1043_v53 = vmul.f32 %v3343_v36, %v3315_v11  ;;  %v3369_v13 = vmul.f32 -1.442695, %v3238_v27  ;;  %vm1048_vm12 = vweird.f32 %v3343_v36 }
 0x1a3   : > { %vm3459_vm14 = vmor %vm1047_vm11, %vm1048_vm12 }
 0x1a4   : > { %v3303_v4 = vpop.f32.mrf.mxu2  ;;  %v3305_v5 = vpop.f32.mrf.mxu3  ;;  %1651 = vmatpush.msrb.mxu1 %v1559_v20  ;;  %v1021_v20 = vand.u32 2147483647, %v3298_v1  ;;  %v1044_v26 = vsub.f32 1.0, %v1043_v53 }
 0x1a5   : > { %4475 = vst [vmem:[#allocation40_spill] sm:$0xff] %v3303_v4 }
 0x1a6   : > { %4476 = vst [vmem:[#allocation41_spill] sm:$0xff] %v3305_v5  ;;  %1652 = vmatpush.msrb.mxu1 %v1558_v49  ;;  %vm3409_vm7 = vcmp.eq.f32.partialorder %v1021_v20, 8.507059e+37  ;;  %v1053_v20 = vand.u32 2147483648, %v3315_v11 }
 0x1a8   : > { %1653 = vmatpush.msrb.mxu1 %v1557_v16 }
 0x1a9   : > { %800 = vmatmul.f32.gmra.mxu2 %v3205_v15  ;;  %865 = vmatmul.f32.gmra.mxu3 %v3205_v15  ;;  %v2104_v15 = vmul.f32 -1.442695, %v3226_v21 }
 0x1ab   : > { %2327 = vpow2.f32 %v2104_v15  ;;  %v1541_v15 = vld [vmem:[%s3041_s5] sm:$0xff] }
 0x1ac   : > { %v3331_v23 = vpop.f32.mrf.mxu2  ;;  %v3333_v24 = vpop.f32.mrf.mxu3  ;;  %2329 = vpow2.f32 %v2093_v18  ;;  %1588 = vmatpush.msrb.mxu0 %v1541_v15 }
 0x1ad   : > { %4477 = vst [vmem:[#allocation42_spill] sm:$0xff] %v3331_v23  ;;  %2331 = vpow2.f32 %v2105_v25  ;;  %v1023_v25 = vand.u32 2147483648, %v3298_v1  ;;  %v1038_v1 = vand.u32 2147483648, %v3308_v7  ;;  %v3444_v7 = vpop.f32.mrf.mxu1 }
 0x1ae   : > { %4478 = vst [vmem:[#allocation43_spill] sm:$0xff] %v3333_v24  ;;  %2333 = vpow2.f32 %v2094_v29  ;;  %v2099_v19 = vmul.f32 -1.442695, %v3444_v7 }
 0x1af   : > { %2335 = vpow2.f32 %v2095_v45  ;;  %v1039_v35 = vor.u32 1.1754944e-38, %v1038_v1  ;;  %v1477_v1 = vmul.f32 %v1010_v61, %v3262_v41 }
 0x1b0   : > { %2337 = vrcp.f32 %v3351_v50 }
 0x1b1   : > { %v2328_v51 = vpop.eup %2327  ;;  %2339 = vpow2.f32 %v2096_v56  ;;  %v1024_v56 = vor.u32 1.1754944e-38, %v1023_v25  ;;  %v2098_v25 = vmul.f32 -1.442695, %v3388_v62 }
 0x1b2   : > { %v2330_v58 = vpop.eup %2329  ;;  %v3390_v31 = vadd.f32 1.0, %v2328_v51 }
 0x1b3   : > { %v2332_v6 = vpop.eup %2331  ;;  %v3386_v29 = vadd.f32 1.0, %v2330_v58  ;;  %v1045_v58 = vmul.f32 %v3343_v36, %v1044_v26  ;;  %v1025_v26 = vsel %vm3409_vm7, %v1024_v56, %v1020_v63  ;;  %v1054_v63 = vor.u32 1.1754944e-38, %v1053_v20 }
 0x1b4   : > { %v3362_v0 = vpop.f32.mrf.mxu2  ;;  %v3364_v3 = vpop.f32.mrf.mxu3  ;;  %v3394_v45 = vadd.f32 1.0, %v2332_v6  ;;  %v1031_v6 = vadd.f32 %v3339_v30, %v1030_v40  ;;  %v1478_v11 = vmul.f32 %v1025_v26, %v3266_v42 }
 0x1b5   : > { %v2334_v18 = vpop.eup %2333  ;;  %2341 = vrcp.f32 %v3386_v29  ;;  %v1046_v39 = vadd.f32 %v3343_v36, %v1045_v58  ;;  %v1509_v61 = vmul.f32 %v1477_v1, %v3362_v0  ;;  %v2107_v0 = vmul.f32 -1.442695, %v3240_v28 }
 0x1b6   : > { %v3407_v49 = vadd.f32 1.0, %v2334_v18  ;;  %v2336_v51 = vpop.eup %2335  ;;  %v1035_v46 = vsel %vm3432_vm10, %v3339_v30, %v1031_v6  ;;  %v1263_v56 = vand.u32 2147483648, %v3394_v45  ;;  %v3471_v30 = vpop.f32.mrf.mxu0  ;;  %v1510_v20 = vmul.f32 %v1478_v11, %v3364_v3 }
 0x1b7   : > { %v3419_v59 = vpop.eup %2337  ;;  %v3439_v14 = vadd.f32 1.0, %v2336_v51  ;;  %v1040_v9 = vsel %vm1037_vm13, %v1039_v35, %v1035_v46  ;;  %1589 = vmatmul.f32.vlgmr.msrb.gmra.mxu0 %v1509_v61  ;;  %v2100_v47 = vmul.f32 -1.442695, %v3471_v30  ;;  %v3516_v35 = vpop.f32.mrf.mxu1  ;;  %vm1077_vm4 = vweird.f32 %v3386_v29 }
 0x1b8   : > { %v2340_v16 = vpop.eup %2339  ;;  %2343 = vrcp.f32 %v3407_v49  ;;  %v1058_v40 = vmul.f32 %v3419_v59, %v3351_v50  ;;  %1654 = vmatmul.f32.vlgmr.msrb.gmra.mxu1 %v1510_v20  ;;  %v3508_v11 = vor.u32 1.1754944e-38, %v1263_v56  ;;  %v1479_v61 = vmul.f32 %v1040_v9, %v3277_v48 }
 0x1b9   : > { %2345 = vpow2.f32 %v2097_v10  ;;  %v3463_v51 = vadd.f32 1.0, %v2340_v16  ;;  %v1248_v10 = vand.u32 2147483648, %v3390_v31  ;;  %v1050_v16 = vsel %vm3459_vm14, %v3343_v36, %v1046_v39 }
 0x1ba   : > { %2347 = vrcp.f32 %v3390_v31  ;;  %v1059_v41 = vsub.f32 1.0, %v1058_v40  ;;  %v1055_v3 = vsel %vm3474_vm15, %v1054_v63, %v1050_v16  ;;  %4492 = vst [vmem:[#allocation45_spill] sm:$0xff] %v3508_v11  ;;  %v1066_v63 = vand.u32 2147483647, %v3351_v50 }
 0x1bb   : > { %v3465_v53 = vpop.eup %2341  ;;  %2349 = vrcp.f32 %v3439_v14  ;;  %v3499_v40 = vor.u32 1.1754944e-38, %v1248_v10  ;;  %v1480_v20 = vmul.f32 %v1055_v3, %v3282_v52  ;;  %vm1063_vm1 = vweird.f32 %v3419_v59 }
 0x1bc   : > { %v3426_v12 = vpop.f32.mrf.mxu2  ;;  %v3428_v15 = vpop.f32.mrf.mxu3  ;;  %2351 = vpow2.f32 %v2098_v25  ;;  %v1073_v42 = vmul.f32 %v3465_v53, %v3386_v29  ;;  %v1060_v58 = vmul.f32 %v3419_v59, %v1059_v41  ;;  %v1068_v48 = vand.u32 2147483648, %v3351_v50  ;;  %vm3555_vm3 = vmor %vm1062_vm0, %vm1063_vm1 }
 0x1bd   : > { %2353 = vrcp.f32 %v3463_v51  ;;  %4491 = vst [vmem:[#allocation44_spill] sm:$0xff] %v3499_v40  ;;  %vm3540_vm2 = vcmp.eq.f32.partialorder %v1066_v63, 8.507059e+37  ;;  %vm1078_vm5 = vweird.f32 %v3465_v53  ;;  %v1083_v24 = vand.u32 2147483648, %v3386_v29 }
 0x1be   : > { %v3478_v6 = vpop.eup %2343  ;;  %2355 = vrcp.f32 %v3394_v45  ;;  %v1074_v16 = vsub.f32 1.0, %v1073_v42  ;;  %v3532_v42 = vpop.f32.mrf.mxu0  ;;  %v1069_v5 = vor.u32 1.1754944e-38, %v1068_v48  ;;  %v1096_v27 = vand.u32 2147483647, %v3407_v49  ;;  %vm3584_vm8 = vmor %vm1077_vm4, %vm1078_vm5 }
 0x1bf   : > { %v2346_v18 = vpop.eup %2345  ;;  %v1088_v46 = vmul.f32 %v3478_v6, %v3407_v49  ;;  %2357 = vpow2.f32 %v3369_v13  ;;  %v1511_v13 = vmul.f32 %v1479_v61, %v3426_v12  ;;  %4493 = vst [vmem:[#allocation46_spill] sm:$0xff] %v3532_v42  ;;  %v1512_v12 = vmul.f32 %v1480_v20, %v3428_v15  ;;  %v3596_v11 = vpop.f32.mrf.mxu1 }
 0x1c0   : > { %v3497_v39 = vpop.eup %2347  ;;  %v3512_v36 = vadd.f32 1.0, %v2346_v18  ;;  %2359 = vpow2.f32 %v2099_v19  ;;  %v2102_v28 = vmul.f32 -1.442695, %v3532_v42  ;;  %vm1092_vm6 = vweird.f32 %v3407_v49  ;;  %4502 = vst [vmem:[#allocation47_spill] sm:$0xff] %v3596_v11 }
 0x1c1   : > { %v3506_v1 = vpop.eup %2349  ;;  %2361 = vpow2.f32 %v2107_v0  ;;  %v1089_v9 = vsub.f32 1.0, %v1088_v46  ;;  %v3537_v19 = vmul.f32 %v3497_v39, %v3390_v31  ;;  %v1061_v0 = vadd.f32 %v3419_v59, %v1060_v58  ;;  %1592 = vmatmul.f32.gmra.mxu0 %v1511_v13  ;;  %1657 = vmatmul.f32.gmra.mxu1 %v1512_v12 }
 0x1c2   : > { %v2352_v10 = vpop.eup %2351  ;;  %2363 = vpow2.f32 %v2100_v47  ;;  %v1103_v18 = vmul.f32 %v3506_v1, %v3439_v14  ;;  %v1075_v46 = vmul.f32 %v3465_v53, %v1074_v16  ;;  %v1081_v58 = vand.u32 2147483647, %v3386_v29 }
 0x1c3   : > { %v3521_v56 = vpop.eup %2353  ;;  %2365 = vrcp.f32 %v3512_v36  ;;  %v3530_v52 = vadd.f32 1.0, %v2352_v10  ;;  %v2101_v16 = vmul.f32 -1.442695, %v3516_v35  ;;  %v1090_v50 = vmul.f32 %v3478_v6, %v1089_v9 }
 0x1c4   : > { %v3489_v25 = vpop.f32.mrf.mxu2  ;;  %v3491_v26 = vpop.f32.mrf.mxu3  ;;  %v1118_v63 = vmul.f32 %v3521_v56, %v3463_v51  ;;  %v1104_v22 = vsub.f32 1.0, %v1103_v18  ;;  %v1065_v13 = vsel %vm3555_vm3, %v3419_v59, %v1061_v0  ;;  %v1076_v55 = vadd.f32 %v3465_v53, %v1075_v46 }
 0x1c5   : > { %v3525_v41 = vpop.eup %2355  ;;  %2367 = vrcp.f32 %v3530_v52  ;;  %vm1093_vm7 = vweird.f32 %v3478_v6  ;;  %vm3588_vm9 = vcmp.eq.f32.partialorder %v1081_v58, 8.507059e+37  ;;  %v1084_v0 = vor.u32 1.1754944e-38, %v1083_v24 }
 0x1c6   : > { %v3549_v10 = vpop.eup %2357  ;;  %v1119_v59 = vsub.f32 1.0, %v1118_v63  ;;  %2369 = vpow2.f32 %v2101_v16  ;;  %v1091_v46 = vadd.f32 %v3478_v6, %v1090_v50  ;;  %v1098_v15 = vand.u32 2147483648, %v3407_v49  ;;  %vm3600_vm10 = vmor %vm1092_vm6, %vm1093_vm7 }
 0x1c7   : > { %v2360_v20 = vpop.eup %2359  ;;  %2371 = vpow2.f32 %v2102_v28  ;;  %v1070_v29 = vsel %vm3540_vm2, %v1069_v5, %v1065_v13  ;;  %vm3604_vm11 = vcmp.eq.f32.partialorder %v1096_v27, 8.507059e+37  ;;  %v1105_v24 = vmul.f32 %v3506_v1, %v1104_v22 }
 0x1c8   : > { %v3568_v23 = vpop.eup %2361  ;;  %v3592_v12 = vadd.f32 1.0, %v2360_v20  ;;  %v1080_v28 = vsel %vm3584_vm8, %v3465_v53, %v1076_v55  ;;  %vm1107_vm12 = vweird.f32 %v3439_v14  ;;  %v1113_v5 = vand.u32 2147483648, %v3439_v14 }
 0x1c9   : > { %v2364_v4 = vpop.eup %2363  ;;  %vm1108_vm13 = vweird.f32 %v3506_v1  ;;  %v1120_v22 = vmul.f32 %v3521_v56, %v1119_v59  ;;  %v1481_v55 = vmul.f32 %v1070_v29, %v3292_v60  ;;  %v1095_v53 = vsel %vm3600_vm10, %v3478_v6, %v1091_v46 }
 0x1ca   : > { %v3578_v9 = vpop.eup %2365  ;;  %v3609_v16 = vadd.f32 1.0, %v2364_v4  ;;  %2373 = vrcp.f32 %v3592_v12  ;;  %v2103_v4 = vmul.f32 -1.442695, %v3596_v11  ;;  %v1099_v20 = vor.u32 1.1754944e-38, %v1098_v15  ;;  %vm3643_vm0 = vmor %vm1107_vm12, %vm1108_vm13 }
 0x1cb   : > { %v1133_v49 = vmul.f32 %v3578_v9, %v3512_v36  ;;  %v3620_v27 = vpop.eup %2367  ;;  %v1111_v50 = vand.u32 2147483647, %v3439_v14  ;;  %v1106_v21 = vadd.f32 %v3506_v1, %v1105_v24  ;;  %vm1122_vm14 = vweird.f32 %v3463_v51 }
 0x1cc   : > { %v3545_v47 = vpop.f32.mrf.mxu2  ;;  %v3547_v61 = vpop.f32.mrf.mxu3  ;;  %vm1123_vm15 = vweird.f32 %v3521_v56  ;;  %2375 = vrcp.f32 %v3609_v16  ;;  %v1085_v59 = vsel %vm3588_vm9, %v1084_v0, %v1080_v28  ;;  %v1128_v46 = vand.u32 2147483648, %v3463_v51  ;;  %v1719_v0 = vld [vmem:[%s3053_s4] sm:$0xff]  ;;  %v1720_v28 = vld [vmem:[%s3053_s4 + $0x8] sm:$0xff] }
 0x1cd   : > { %v2370_v48 = vpop.eup %2369  ;;  %v1134_v15 = vsub.f32 1.0, %v1133_v49  ;;  %v1148_v29 = vmul.f32 %v3620_v27, %v3530_v52  ;;  %v1114_v58 = vor.u32 1.1754944e-38, %v1113_v5  ;;  %v1121_v24 = vadd.f32 %v3521_v56, %v1120_v22  ;;  %vm3657_vm1 = vmor %vm1122_vm14, %vm1123_vm15 }
 0x1ce   : > { %v2372_v60 = vpop.eup %2371  ;;  %v1126_v18 = vand.u32 2147483647, %v3463_v51  ;;  %2377 = vpow2.f32 %v2103_v4  ;;  %v1100_v14 = vsel %vm3604_vm11, %v1099_v20, %v1095_v53  ;;  %v3661_v49 = vadd.f32 1.0, %v2370_v48  ;;  %v1721_v20 = vld [vmem:[%s3053_s4 + $0x10] sm:$0xff] }
 0x1cf   : > { %v1513_v5 = vmul.f32 %v1481_v55, %v3489_v25  ;;  %v3668_v22 = vmul.f32 %v3525_v41, %v3394_v45  ;;  %v1110_v63 = vsel %vm3643_vm0, %v3506_v1, %v1106_v21  ;;  %vm3673_vm2 = vcmp.eq.f32.partialorder %v1111_v50, 8.507059e+37 }
 0x1d0   : > { %v3664_v11 = vpop.eup %2373  ;;  %v3677_v4 = vadd.f32 1.0, %v2372_v60  ;;  %v2681_v53 = vmov 0   ;;  %v2108_v25 = vmul.f32 -1.442695, %v3248_v33  ;;  %v1129_v55 = vor.u32 1.1754944e-38, %v1128_v46 }
 0x1d1   : > { %2306 = vset.pattern.permute.xlu0 %v2681_v53  ;;  %v1135_v48 = vmul.f32 %v3578_v9, %v1134_v15  ;;  %v1149_v40 = vsub.f32 1.0, %v1148_v29  ;;  %1595 = vmatmul.f32.gmra.mxu0 %v1513_v5  ;;  %v1482_v1 = vmul.f32 %v1085_v59, %v3300_v2  ;;  %v1483_v50 = vmul.f32 %v1100_v14, %v3310_v8 }
 0x1d2   : > { %1737 = vperm.xlu0 %2306, %v1719_v0   ;;  %v3684_v21 = vpop.eup %2375  ;;  %v1125_v60 = vsel %vm3657_vm1, %v3521_v56, %v1121_v24  ;;  %vm1127_vm3 = vcmp.eq.f32.partialorder %v1126_v18, 8.507059e+37  ;;  %2307 = vset.pattern.permute.xlu1 %v2681_v53  ;;  %v1115_v6 = vsel %vm3673_vm2, %v1114_v58, %v1110_v63  ;;  %vm1137_vm4 = vweird.f32 %v3512_v36 }
 0x1d3   : > { %2308 = vset.pattern.permute.xlu2 %v2681_v53  ;;  %v1163_v46 = vmul.f32 %v3664_v11, %v3592_v12  ;;  %2379 = vrcp.f32 %v3661_v49  ;;  %1747 = vperm.xlu1 %2307, %v1721_v20   ;;  %vm1138_vm5 = vweird.f32 %v3578_v9  ;;  %v1141_v8 = vand.u32 2147483647, %v3512_v36 }
 0x1d4   : > { %v3618_v3 = vpop.f32.mrf.mxu2  ;;  %v3631_v13 = vpop.f32.mrf.mxu3  ;;  %v1143_v56 = vand.u32 2147483648, %v3512_v36  ;;  %2381 = vrcp.f32 %v3677_v4  ;;  %v1130_v59 = vsel %vm1127_vm3, %v1129_v55, %v1125_v60  ;;  %v1136_v15 = vadd.f32 %v3578_v9, %v1135_v48  ;;  %vm3714_vm7 = vmor %vm1137_vm4, %vm1138_vm5  ;;  %v1722_v36 = vld [vmem:[%s3053_s4 + $0x18] sm:$0xff] }
 0x1d5   : > { %v2378_v2 = vpop.eup %2377  ;;  %v1150_v29 = vmul.f32 %v3620_v27, %v1149_v40  ;;  %v1178_v58 = vmul.f32 %v3684_v21, %v3609_v16  ;;  %vm1152_vm6 = vweird.f32 %v3530_v52  ;;  %v1156_v18 = vand.u32 2147483647, %v3530_v52 }
 0x1d6   : > { %v1158_v0 = vand.u32 2147483648, %v3530_v52  ;;  %v1514_v14 = vmul.f32 %v1482_v1, %v3491_v26  ;;  %vm1153_vm8 = vweird.f32 %v3620_v27  ;;  %v1164_v40 = vsub.f32 1.0, %v1163_v46 }
 0x1d7   : > { %v3719_v63 = vadd.f32 1.0, %v2378_v2  ;;  %v1515_v51 = vmul.f32 %v1483_v50, %v3545_v47  ;;  %v1239_v53 = vsub.f32 1.0, %v3537_v19  ;;  %v1254_v20 = vsub.f32 1.0, %v3668_v22  ;;  %vm3751_vm10 = vmor %vm1152_vm6, %vm1153_vm8 }
 0x1d8   : > { %v3725_v26 = vadd.f32 1.0, %v3549_v10  ;;  %2383 = vpow2.f32 %v2108_v25  ;;  %1660 = vmatmul.f32.gmra.mxu1 %v1514_v14  ;;  %v3731_v48 = vadd.f32 1.0, %v3568_v23  ;;  %v1484_v1 = vmul.f32 %v1115_v6, %v3325_v17 }
 0x1d9   : > { %v3728_v55 = vpop.eup %2379  ;;  %v1151_v60 = vadd.f32 %v3620_v27, %v1150_v29  ;;  %v1179_v47 = vsub.f32 1.0, %v1178_v58  ;;  %1598 = vmatmul.f32.gmra.mxu0 %v1515_v51  ;;  %v1485_v10 = vmul.f32 %v1130_v59, %v3341_v32  ;;  %v1140_v25 = vsel %vm3714_vm7, %v3578_v9, %v1136_v15 }
 0x1da   : > { %1742 = vperm.xlu0 %2306, %v1720_v28   ;;  %v3737_v50 = vpop.eup %2381  ;;  %vm3743_vm9 = vcmp.eq.f32.partialorder %v1141_v8, 8.507059e+37  ;;  %v1144_v17 = vor.u32 1.1754944e-38, %v1143_v56  ;;  %vm3755_vm11 = vcmp.eq.f32.partialorder %v1156_v18, 8.507059e+37  ;;  %v1159_v32 = vor.u32 1.1754944e-38, %v1158_v0 }
 0x1db   : > { %v1165_v9 = vmul.f32 %v3664_v11, %v1164_v40  ;;  %2385 = vrcp.f32 %v3719_v63  ;;  %1752 = vperm.xlu1 %2307, %v1722_v36   ;;  %vm1167_vm12 = vweird.f32 %v3592_v12  ;;  %vm1168_vm13 = vweird.f32 %v3664_v11 }
 0x1dc   : > { %v3682_v42 = vpop.f32.mrf.mxu2  ;;  %v3705_v24 = vpop.f32.mrf.mxu3  ;;  %v1193_v52 = vmul.f32 %v3728_v55, %v3661_v49  ;;  %v1516_v2 = vmul.f32 %v1484_v1, %v3547_v61  ;;  %v1155_v8 = vsel %vm3751_vm10, %v3620_v27, %v1151_v60  ;;  %v1180_v56 = vmul.f32 %v3684_v21, %v1179_v47  ;;  %vm3793_vm0 = vmor %vm1167_vm12, %vm1168_vm13 }
 0x1dd   : > { %v1208_v59 = vmul.f32 %v3737_v50, %v3677_v4  ;;  %v1517_v15 = vmul.f32 %v1485_v10, %v3618_v3  ;;  %v3774_v58 = vmul.f32 %v3497_v39, %v1239_v53  ;;  %v2109_v18 = vmul.f32 -1.442695, %v3250_v34  ;;  %v1725_v53 = vld [vmem:[%s3053_s4 + $0x30] sm:$0xff] }
 0x1de   : > { %v2384_v29 = vpop.eup %2383  ;;  %v1145_v61 = vsel %vm3743_vm9, %v1144_v17, %v1140_v25  ;;  %v1173_v0 = vand.u32 2147483648, %v3592_v12  ;;  %v1166_v27 = vadd.f32 %v3664_v11, %v1165_v9  ;;  %v1171_v14 = vand.u32 2147483647, %v3592_v12 }
 0x1df   : > { %vm1182_vm14 = vweird.f32 %v3609_v16  ;;  %vm1183_vm15 = vweird.f32 %v3684_v21  ;;  %2387 = vrcp.f32 %v3725_v26  ;;  %v1160_v28 = vsel %vm3755_vm11, %v1159_v32, %v1155_v8 }
 0x1e0   : > { %v1188_v40 = vand.u32 2147483648, %v3609_v16  ;;  %v1194_v51 = vsub.f32 1.0, %v1193_v52  ;;  %1663 = vmatmul.f32.gmra.mxu1 %v1516_v2  ;;  %2389 = vrcp.f32 %v3731_v48  ;;  %v1181_v1 = vadd.f32 %v3684_v21, %v1180_v56  ;;  %vm3812_vm1 = vmor %vm1182_vm14, %vm1183_vm15 }
 0x1e1   : > { %v3799_v36 = vpop.eup %2385  ;;  %v1186_v60 = vand.u32 2147483647, %v3609_v16  ;;  %v1209_v47 = vsub.f32 1.0, %v1208_v59  ;;  %1601 = vmatmul.f32.gmra.mxu0 %v1517_v15  ;;  %v3804_v12 = vadd.f32 1.0, %v2384_v29  ;;  %v2110_v10 = vmul.f32 -1.442695, %v3256_v37 }
 0x1e2   : > { %1767 = vperm.xlu0 %2306, %v1725_v53   ;;  %v1486_v25 = vmul.f32 %v1145_v61, %v3358_v57  ;;  %v1174_v23 = vor.u32 1.1754944e-38, %v1173_v0  ;;  %2391 = vpow2.f32 %v2109_v18  ;;  %v1487_v46 = vmul.f32 %v1160_v28, %v3388_v62  ;;  %v1723_v61 = vld [vmem:[%s3053_s4 + $0x20] sm:$0xff]  ;;  %v1726_v0 = vld [vmem:[%s3053_s4 + $0x38] sm:$0xff] }
 0x1e3   : > { %v1170_v32 = vsel %vm3793_vm0, %v3664_v11, %v1166_v27  ;;  %vm1172_vm2 = vcmp.eq.f32.partialorder %v1171_v14, 8.507059e+37  ;;  %v1189_v57 = vor.u32 1.1754944e-38, %v1188_v40  ;;  %v1195_v9 = vmul.f32 %v3728_v55, %v1194_v51  ;;  %1757 = vperm.xlu2 %2308, %v1723_v61   ;;  %1772 = vperm.xlu1 %2307, %v1726_v0   ;;  %v4555_v0 = vld [vmem:[#allocation40_spill] sm:$0xff] }
 0x1e4   : > { %v3735_v19 = vpop.f32.mrf.mxu2  ;;  %v3784_v3 = vpop.f32.mrf.mxu3  ;;  %v1223_v16 = vmul.f32 %v3799_v36, %v3719_v63  ;;  %v1518_v52 = vmul.f32 %v1486_v25, %v3631_v13  ;;  %vm1243_vm3 = vweird.f32 %v3497_v39  ;;  %v1185_v2 = vsel %vm3812_vm1, %v3684_v21, %v1181_v1 }
 0x1e5   : > { %vm1187_vm4 = vcmp.eq.f32.partialorder %v1186_v60, 8.507059e+37  ;;  %v1210_v62 = vmul.f32 %v3737_v50, %v1209_v47  ;;  %v1519_v11 = vmul.f32 %v1487_v46, %v3682_v42  ;;  %v3832_v8 = vpop.eup %2387  ;;  %2393 = vpow2.f32 %v2110_v10 }
 0x1e6   : > { %v1175_v56 = vsel %vm1172_vm2, %v1174_v23, %v1170_v32  ;;  %vm1197_vm5 = vweird.f32 %v3661_v49  ;;  %vm1198_vm6 = vweird.f32 %v3728_v55  ;;  %v3836_v13 = vpop.eup %2389  ;;  %vm1242_vm7 = vweird.f32 %v3390_v31 }
 0x1e7   : > { %v1201_v21 = vand.u32 2147483647, %v3661_v49  ;;  %v1203_v59 = vand.u32 2147483648, %v3661_v49  ;;  %vm1212_vm8 = vweird.f32 %v3677_v4  ;;  %vm1213_vm9 = vweird.f32 %v3737_v50  ;;  %vm3853_vm10 = vmor %vm1197_vm5, %vm1198_vm6 }
 0x1e8   : > { %v1190_v42 = vsel %vm1187_vm4, %v1189_v57, %v1185_v2  ;;  %v1196_v15 = vadd.f32 %v3728_v55, %v1195_v9  ;;  %v1218_v29 = vand.u32 2147483648, %v3677_v4  ;;  %v1224_v18 = vsub.f32 1.0, %v1223_v16  ;;  %1666 = vmatmul.f32.gmra.mxu1 %v1518_v52  ;;  %v2392_v27 = vpop.eup %2391  ;;  %vm3875_vm11 = vmor %vm1212_vm8, %vm1213_vm9  ;;  %v4550_v52 = vld [vmem:[#allocation45_spill] sm:$0xff] }
 0x1e9   : > { %2395 = vrcp.f32 %v3804_v12  ;;  %v2111_v14 = vmul.f32 -1.442695, %v3258_v38  ;;  %v1211_v5 = vadd.f32 %v3737_v50, %v1210_v62  ;;  %v1216_v40 = vand.u32 2147483647, %v3677_v4  ;;  %1604 = vmatmul.f32.gmra.mxu0 %v1519_v11  ;;  %vm3919_vm4 = vmor %vm1242_vm7, %vm1243_vm3 }
 0x1ea   : > { %v3863_v53 = vadd.f32 %v3497_v39, %v3774_v58  ;;  %v1255_v49 = vmul.f32 %v3525_v41, %v1254_v20  ;;  %v1268_v1 = vmul.f32 %v3832_v8, %v3725_v26  ;;  %v1488_v60 = vmul.f32 %v1175_v56, %v3444_v7 }
 0x1eb   : > { %v2112_v58 = vmul.f32 -1.442695, %v3268_v43  ;;  %v1489_v22 = vmul.f32 %v1190_v42, %v3471_v30  ;;  %vm3881_vm12 = vcmp.eq.f32.partialorder %v1201_v21, 8.507059e+37  ;;  %v1204_v10 = vor.u32 1.1754944e-38, %v1203_v59  ;;  %v2394_v25 = vpop.eup %2393  ;;  %v1724_v42 = vld [vmem:[%s3053_s4 + $0x28] sm:$0xff] }
 0x1ec   : > { %v3816_v6 = vpop.f32.mrf.mxu2  ;;  %v3859_v51 = vpop.f32.mrf.mxu3  ;;  %v4531_v7 = vand.u32 2147483647, %v3390_v31  ;;  %vm1257_vm14 = vweird.f32 %v3394_v45  ;;  %v1200_v4 = vsel %vm3853_vm10, %v3728_v55, %v1196_v15  ;;  %v1219_v17 = vor.u32 1.1754944e-38, %v1218_v29  ;;  %v1728_v15 = vld [vmem:[%s3053_s4 + $0x48] sm:$0xff]  ;;  %1762 = vperm.xlu2 %2308, %v1724_v42  }
 0x1ed   : > { %v1225_v30 = vmul.f32 %v3799_v36, %v1224_v18  ;;  %v1520_v46 = vmul.f32 %v1488_v60, %v3705_v24  ;;  %2397 = vpow2.f32 %v2111_v14  ;;  %v1215_v57 = vsel %vm3875_vm11, %v3737_v50, %v1211_v5  ;;  %1782 = vperm.xlu0 %2306, %v1728_v15   ;;  %v4541_v5 = vld [vmem:[#allocation46_spill] sm:$0xff]  ;;  %v4552_v15 = vld [vmem:[#allocation47_spill] sm:$0xff] }
 0x1ee   : > { %vm3887_vm13 = vcmp.eq.f32.partialorder %v4531_v7, 8.507059e+37  ;;  %vm1217_vm15 = vcmp.eq.f32.partialorder %v1216_v40, 8.507059e+37  ;;  %v1521_v9 = vmul.f32 %v1489_v22, %v3735_v19  ;;  %vm1258_vm0 = vweird.f32 %v3525_v41  ;;  %v4544_v22 = vld [vmem:[#allocation44_spill] sm:$0xff] }
 0x1ef   : > { %v3904_v16 = vadd.f32 1.0, %v2392_v27  ;;  %vm1227_vm1 = vweird.f32 %v3719_v63  ;;  %vm1228_vm2 = vweird.f32 %v3799_v36  ;;  %v3908_v24 = vpop.eup %2395  ;;  %v3910_v55 = vadd.f32 1.0, %v2394_v25  ;;  %vm3975_vm7 = vmor %vm1257_vm14, %vm1258_vm0 }
 0x1f0   : > { %2399 = vpow2.f32 %v2112_v58  ;;  %v1205_v50 = vsel %vm3881_vm12, %v1204_v10, %v1200_v4  ;;  %v1233_v19 = vand.u32 2147483648, %v3719_v63  ;;  %v4536_v2 = vand.u32 2147483647, %v3394_v45  ;;  %1669 = vmatmul.f32.gmra.mxu1 %v1520_v46  ;;  %vm3945_vm3 = vmor %vm1227_vm1, %vm1228_vm2  ;;  %v4549_v46 = vld [vmem:[#allocation35_spill] sm:$0xff] }
 0x1f1   : > { %v1269_v11 = vsub.f32 1.0, %v1268_v1  ;;  %v1220_v56 = vsel %vm1217_vm15, %v1219_v17, %v1215_v57  ;;  %v1226_v21 = vadd.f32 %v3799_v36, %v1225_v30  ;;  %v1231_v59 = vand.u32 2147483647, %v3719_v63  ;;  %1607 = vmatmul.f32.gmra.mxu0 %v1521_v9 }
 0x1f2   : > { %vm3925_vm5 = vcmp.eq.f32.partialorder %v4536_v2, 8.507059e+37  ;;  %v1245_v31 = vsel %vm3919_vm4, %v3497_v39, %v3863_v53  ;;  %v1256_v29 = vadd.f32 %v3525_v41, %v1255_v49  ;;  %v1276_v18 = vand.u32 2147483647, %v3725_v26 }
 0x1f3   : > { %v1283_v61 = vmul.f32 %v3836_v13, %v3731_v48  ;;  %v1298_v39 = vmul.f32 %v3908_v24, %v3804_v12  ;;  %2401 = vrcp.f32 %v3904_v16  ;;  %v2113_v27 = vmul.f32 -1.442695, %v3270_v44  ;;  %v2398_v28 = vpop.eup %2397 }
 0x1f4   : > { %v3897_v32 = vpop.f32.mrf.mxu2  ;;  %v1490_v14 = vmul.f32 %v1205_v50, %v3516_v35  ;;  %2403 = vrcp.f32 %v3910_v55  ;;  %v2114_v63 = vmul.f32 -1.442695, %v3285_v54  ;;  %v1491_v40 = vmul.f32 %v1220_v56, %v4541_v5  ;;  %v3957_v49 = vpop.f32.mrf.mxu3  ;;  %v1731_v50 = vld [vmem:[%s3053_s4 + $0x60] sm:$0xff] }
 0x1f5   : > { %v1234_v53 = vor.u32 1.1754944e-38, %v1233_v19  ;;  %v1270_v1 = vmul.f32 %v3832_v8, %v1269_v11  ;;  %v1230_v60 = vsel %vm3945_vm3, %v3799_v36, %v1226_v21  ;;  %vm3963_vm6 = vcmp.eq.f32.partialorder %v1231_v59, 8.507059e+37  ;;  %v4551_v59 = vld [vmem:[#allocation39_spill] sm:$0xff]  ;;  %1797 = vperm.xlu0 %2306, %v1731_v50  }
 0x1f6   : > { %v1522_v35 = vmul.f32 %v1490_v14, %v3784_v3  ;;  %v2400_v58 = vpop.eup %2399  ;;  %v1250_v20 = vsel %vm3887_vm13, %v4544_v22, %v1245_v31  ;;  %v1278_v36 = vand.u32 2147483648, %v3725_v26  ;;  %v1284_v25 = vsub.f32 1.0, %v1283_v61 }
 0x1f7   : > { %v1523_v7 = vmul.f32 %v1491_v40, %v3816_v6  ;;  %v1260_v3 = vsel %vm3975_vm7, %v3525_v41, %v1256_v29  ;;  %v1299_v23 = vsub.f32 1.0, %v1298_v39  ;;  %v3984_v4 = vadd.f32 1.0, %v2398_v28 }
 0x1f8   : > { %2405 = vpow2.f32 %v2113_v27  ;;  %vm1272_vm8 = vweird.f32 %v3725_v26  ;;  %vm3989_vm9 = vcmp.eq.f32.partialorder %v1276_v18, 8.507059e+37  ;;  %v1235_v6 = vsel %vm3963_vm6, %v1234_v53, %v1230_v60  ;;  %1672 = vmatmul.f32.gmra.mxu1 %v1522_v35 }
 0x1f9   : > { %2407 = vpow2.f32 %v2114_v63  ;;  %v3995_v30 = vpop.eup %2401  ;;  %v1493_v41 = vmul.f32 %v1250_v20, %v4549_v46  ;;  %v1271_v57 = vadd.f32 %v3832_v8, %v1270_v1  ;;  %vm1273_vm10 = vweird.f32 %v3832_v8  ;;  %1610 = vmatmul.f32.gmra.mxu0 %v1523_v7  ;;  %v1729_v7 = vld [vmem:[%s3053_s4 + $0x50] sm:$0xff] }
 0x1fa   : > { %v4000_v9 = vadd.f32 1.0, %v2400_v58  ;;  %v4003_v19 = vpop.eup %2403  ;;  %v1265_v2 = vsel %vm3925_vm5, %v4550_v52, %v1260_v3  ;;  %v1279_v11 = vor.u32 1.1754944e-38, %v1278_v36  ;;  %v1285_v56 = vmul.f32 %v3836_v13, %v1284_v25  ;;  %vm4018_vm12 = vmor %vm1272_vm8, %vm1273_vm10  ;;  %v1734_v3 = vld [vmem:[%s3053_s4 + $0x78] sm:$0xff]  ;;  %1787 = vperm.xlu1 %2307, %v1729_v7  }
 0x1fb   : > { %vm1287_vm11 = vweird.f32 %v3731_v48  ;;  %v1300_v21 = vmul.f32 %v3908_v24, %v1299_v23  ;;  %2409 = vrcp.f32 %v3984_v4  ;;  %v2115_v42 = vmul.f32 -1.442695, %v4551_v59 }
 0x1fc   : > { %v3986_v17 = vpop.f32.mrf.mxu2  ;;  %v1492_v31 = vmul.f32 %v1235_v6, %v4552_v15  ;;  %v1291_v29 = vand.u32 2147483647, %v3731_v48  ;;  %v1293_v18 = vand.u32 2147483648, %v3731_v48  ;;  %v1313_v61 = vmul.f32 %v3995_v30, %v3904_v16  ;;  %v4038_v1 = vpop.f32.mrf.mxu3 }
 0x1fd   : > { %v2116_v39 = vmul.f32 -1.442695, %v4555_v0  ;;  %v1275_v14 = vsel %vm4018_vm12, %v3832_v8, %v1271_v57  ;;  %v1328_v26 = vmul.f32 %v4003_v19, %v3910_v55  ;;  %2411 = vrcp.f32 %v4000_v9  ;;  %1812 = vperm.xlu0 %2306, %v1734_v3  }
 0x1fe   : > { %v2406_v27 = vpop.eup %2405  ;;  %v1524_v28 = vmul.f32 %v1492_v31, %v3859_v51  ;;  %vm1288_vm13 = vweird.f32 %v3836_v13  ;;  %v1306_v5 = vand.u32 2147483647, %v3804_v12  ;;  %v1308_v40 = vand.u32 2147483648, %v3804_v12 }
 0x1ff   : > { %v2408_v63 = vpop.eup %2407  ;;  %v1525_v53 = vmul.f32 %v1493_v41, %v3897_v32  ;;  %v1286_v8 = vadd.f32 %v3836_v13, %v1285_v56  ;;  %v1301_v60 = vadd.f32 %v3908_v24, %v1300_v21  ;;  %vm1303_vm14 = vweird.f32 %v3908_v24  ;;  %v4556_v32 = vld [vmem:[#allocation36_spill] sm:$0xff]  ;;  %vm4054_vm15 = vmor %vm1287_vm11, %vm1288_vm13  ;;  %v4565_v41 = vld [vmem:[#allocation37_spill] sm:$0xff] }
 0x200   : > { %2413 = vpow2.f32 %v2115_v42  ;;  %v1280_v51 = vsel %vm3989_vm9, %v1279_v11, %v1275_v14  ;;  %v1314_v47 = vsub.f32 1.0, %v1313_v61  ;;  %v4045_v35 = vadd.f32 1.0, %v2406_v27  ;;  %1675 = vmatmul.f32.gmra.mxu1 %v1524_v28  ;;  %v4567_v42 = vld [vmem:[#allocation42_spill] sm:$0xff] }
 0x201   : > { %2415 = vpow2.f32 %v2116_v39  ;;  %v4047_v58 = vpop.eup %2409  ;;  %v1494_v22 = vmul.f32 %v1265_v2, %v4556_v32  ;;  %vm1302_vm0 = vweird.f32 %v3804_v12  ;;  %v1329_v10 = vsub.f32 1.0, %v1328_v26  ;;  %1613 = vmatmul.f32.gmra.mxu0 %v1525_v53  ;;  %v4566_v2 = vld [vmem:[#allocation41_spill] sm:$0xff]  ;;  %v1727_v53 = vld [vmem:[%s3053_s4 + $0x40] sm:$0xff] }
 0x202   : > { %v4059_v36 = vadd.f32 1.0, %v2408_v63  ;;  %vm4065_vm1 = vcmp.eq.f32.partialorder %v1291_v29, 8.507059e+37  ;;  %v1294_v45 = vor.u32 1.1754944e-38, %v1293_v18  ;;  %vm4071_vm2 = vmor %vm1302_vm0, %vm1303_vm14  ;;  %vm4075_vm4 = vcmp.eq.f32.partialorder %v1306_v5, 8.507059e+37  ;;  %1777 = vperm.xlu2 %2308, %v1727_v53  }
 0x203   : > { %v1309_v6 = vor.u32 1.1754944e-38, %v1308_v40  ;;  %v4079_v46 = vpop.eup %2411  ;;  %v1495_v57 = vmul.f32 %v1280_v51, %v4565_v41  ;;  %v1290_v50 = vsel %vm4054_vm15, %v3836_v13, %v1286_v8  ;;  %v1305_v52 = vsel %vm4071_vm2, %v3908_v24, %v1301_v60  ;;  %v1732_v8 = vld [vmem:[%s3053_s4 + $0x68] sm:$0xff]  ;;  %v4568_v51 = vld [vmem:[#allocation38_spill] sm:$0xff] }
 0x204   : > { %v4061_v25 = vpop.f32.mrf.mxu2  ;;  %v2117_v11 = vmul.f32 -1.442695, %v4566_v2  ;;  %v1315_v56 = vmul.f32 %v3995_v30, %v1314_v47  ;;  %v1343_v21 = vmul.f32 %v4047_v58, %v3984_v4  ;;  %2417 = vrcp.f32 %v4045_v35  ;;  %v4111_v5 = vpop.f32.mrf.mxu3  ;;  %1802 = vperm.xlu1 %2307, %v1732_v8  }
 0x205   : > { %v2118_v15 = vmul.f32 -1.442695, %v4567_v42  ;;  %v1321_v62 = vand.u32 2147483647, %v3904_v16  ;;  %v1330_v13 = vmul.f32 %v4003_v19, %v1329_v10  ;;  %2419 = vrcp.f32 %v4059_v36 }
 0x206   : > { %v2414_v31 = vpop.eup %2413  ;;  %v1526_v24 = vmul.f32 %v1494_v22, %v3957_v49  ;;  %v1295_v18 = vsel %vm4065_vm1, %v1294_v45, %v1290_v50  ;;  %v1323_v61 = vand.u32 2147483648, %v3904_v16  ;;  %v1358_v39 = vmul.f32 %v4079_v46, %v4000_v9  ;;  %v4573_v45 = vld [vmem:[#allocation43_spill] sm:$0xff] }
 0x207   : > { %v2416_v29 = vpop.eup %2415  ;;  %v1527_v27 = vmul.f32 %v1495_v57, %v3986_v17  ;;  %v1310_v14 = vsel %vm4075_vm4, %v1309_v6, %v1305_v52  ;;  %vm1318_vm5 = vweird.f32 %v3995_v30  ;;  %v1338_v49 = vand.u32 2147483648, %v3910_v55 }
 0x208   : > { %2421 = vpow2.f32 %v2117_v11  ;;  %v1316_v26 = vadd.f32 %v3995_v30, %v1315_v56  ;;  %v1344_v28 = vsub.f32 1.0, %v1343_v21  ;;  %v4109_v63 = vadd.f32 1.0, %v2414_v31  ;;  %1678 = vmatmul.f32.gmra.mxu1 %v1526_v24 }
 0x209   : > { %2423 = vpow2.f32 %v2118_v15  ;;  %vm1317_vm3 = vweird.f32 %v3904_v16  ;;  %v1331_v17 = vadd.f32 %v4003_v19, %v1330_v13  ;;  %vm1333_vm6 = vweird.f32 %v4003_v19  ;;  %1616 = vmatmul.f32.gmra.mxu0 %v1527_v27 }
 0x20a   : > { %v4116_v40 = vadd.f32 1.0, %v2416_v29  ;;  %v4120_v60 = vpop.eup %2417  ;;  %v1496_v47 = vmul.f32 %v1295_v18, %v4568_v51  ;;  %vm4123_vm7 = vcmp.eq.f32.partialorder %v1321_v62, 8.507059e+37  ;;  %v1324_v22 = vor.u32 1.1754944e-38, %v1323_v61  ;;  %vm4134_vm8 = vmor %vm1317_vm3, %vm1318_vm5 }
 0x20b   : > { %v1359_v20 = vsub.f32 1.0, %v1358_v39  ;;  %v4127_v10 = vpop.eup %2419  ;;  %v1497_v7 = vmul.f32 %v1310_v14, %v3248_v33  ;;  %vm1332_vm9 = vweird.f32 %v3910_v55  ;;  %v1336_v23 = vand.u32 2147483647, %v3910_v55 }
 0x20c   : > { %v2119_v48 = vmul.f32 -1.442695, %v4573_v45  ;;  %v789_v12 = vpop.f32.mrf.mxu2  ;;  %v1320_v33 = vsel %vm4134_vm8, %v3995_v30, %v1316_v26  ;;  %vm4146_vm10 = vmor %vm1332_vm9, %vm1333_vm6  ;;  %v1339_v6 = vor.u32 1.1754944e-38, %v1338_v49  ;;  %v1345_v41 = vmul.f32 %v4047_v58, %v1344_v28  ;;  %v854_v27 = vpop.f32.mrf.mxu3 }
 0x20d   : > { %2425 = vrcp.f32 %v4109_v63  ;;  %v1335_v57 = vsel %vm4146_vm10, %v4003_v19, %v1331_v17  ;;  %v1373_v50 = vmul.f32 %v4120_v60, %v4045_v35  ;;  %v1528_v30 = vmul.f32 %v1496_v47, %v4038_v1 }
 0x20e   : > { %v2422_v55 = vpop.eup %2421  ;;  %2427 = vrcp.f32 %v4116_v40  ;;  %v1351_v11 = vand.u32 2147483647, %v3984_v4  ;;  %v1360_v56 = vmul.f32 %v4079_v46, %v1359_v20  ;;  %v1388_v21 = vmul.f32 %v4127_v10, %v4059_v36 }
 0x20f   : > { %v2424_v52 = vpop.eup %2423  ;;  %v1529_v15 = vmul.f32 %v1497_v7, %v4061_v25  ;;  %v1325_v19 = vsel %vm4123_vm7, %v1324_v22, %v1320_v33  ;;  %vm1337_vm11 = vcmp.eq.f32.partialorder %v1336_v23, 8.507059e+37  ;;  %v1353_v31 = vand.u32 2147483648, %v3984_v4 }
 0x210   : > { %2429 = vpow2.f32 %v2119_v48  ;;  %v1340_v62 = vsel %vm1337_vm11, %v1339_v6, %v1335_v57  ;;  %v1346_v1 = vadd.f32 %v4047_v58, %v1345_v41  ;;  %vm1348_vm12 = vweird.f32 %v4047_v58  ;;  %1681 = vmatmul.f32.gmra.mxu1 %v1528_v30  ;;  %v1730_v6 = vld [vmem:[%s3053_s4 + $0x58] sm:$0xff] }
 0x211   : > { %v4169_v13 = vadd.f32 1.0, %v2422_v55  ;;  %vm1347_vm13 = vweird.f32 %v3984_v4  ;;  %v1374_v24 = vsub.f32 1.0, %v1373_v50  ;;  %v4172_v29 = vadd.f32 1.0, %v2424_v52  ;;  %1619 = vmatmul.f32.gmra.mxu0 %v1529_v15  ;;  %1792 = vperm.xlu2 %2308, %v1730_v6  }
 0x212   : > { %vm4176_vm14 = vcmp.eq.f32.partialorder %v1351_v11, 8.507059e+37  ;;  %v1361_v61 = vadd.f32 %v4079_v46, %v1360_v56  ;;  %vm1363_vm15 = vweird.f32 %v4079_v46  ;;  %v1389_v39 = vsub.f32 1.0, %v1388_v21  ;;  %vm4188_vm0 = vmor %vm1347_vm13, %vm1348_vm12 }
 0x213   : > { %v4174_v25 = vpop.eup %2425  ;;  %v1498_v4 = vmul.f32 %v1325_v19, %v3250_v34  ;;  %v1499_v49 = vmul.f32 %v1340_v62, %v3256_v37  ;;  %v1354_v28 = vor.u32 1.1754944e-38, %v1353_v31  ;;  %v1368_v17 = vand.u32 2147483648, %v4000_v9 }
 0x214   : > { %v4182_v14 = vpop.eup %2427  ;;  %v1350_v53 = vsel %vm4188_vm0, %v4047_v58, %v1346_v1  ;;  %vm1362_vm1 = vweird.f32 %v4000_v9  ;;  %v1366_v8 = vand.u32 2147483647, %v4000_v9  ;;  %2431 = vrcp.f32 %v4169_v13  ;;  %v792_v9 = vpop.f32.mrf.mxu2 }
 0x215   : > { %vm4201_vm2 = vmor %vm1362_vm1, %vm1363_vm15  ;;  %v1375_v51 = vmul.f32 %v4120_v60, %v1374_v24  ;;  %v1403_v47 = vmul.f32 %v4174_v25, %v4109_v63  ;;  %2433 = vrcp.f32 %v4172_v29  ;;  %v1530_v58 = vmul.f32 %v1498_v4, %v4111_v5  ;;  %v857_v15 = vpop.f32.mrf.mxu3 }
 0x216   : > { %v2430_v34 = vpop.eup %2429  ;;  %v1365_v32 = vsel %vm4201_vm2, %v4079_v46, %v1361_v61  ;;  %v1390_v22 = vmul.f32 %v4127_v10, %v1389_v39  ;;  %v1418_v20 = vmul.f32 %v4182_v14, %v4116_v40  ;;  %v1531_v7 = vmul.f32 %v1499_v49, %v789_v12 }
 0x217   : > { %v1355_v3 = vsel %vm4176_vm14, %v1354_v28, %v1350_v53  ;;  %v1369_v23 = vor.u32 1.1754944e-38, %v1368_v17  ;;  %v1383_v48 = vand.u32 2147483648, %v4045_v35  ;;  %vm1367_vm4 = vcmp.eq.f32.partialorder %v1366_v8, 8.507059e+37 }
 0x218   : > { %v4219_v5 = vadd.f32 1.0, %v2430_v34  ;;  %v1376_v16 = vadd.f32 %v4120_v60, %v1375_v51  ;;  %vm1378_vm5 = vweird.f32 %v4120_v60  ;;  %v1404_v46 = vsub.f32 1.0, %v1403_v47  ;;  %1684 = vmatmul.f32.gmra.mxu1 %v1530_v58 }
 0x219   : > { %v1370_v33 = vsel %vm1367_vm4, %v1369_v23, %v1365_v32  ;;  %v1500_v12 = vmul.f32 %v1355_v3, %v3258_v38  ;;  %v1391_v55 = vadd.f32 %v4127_v10, %v1390_v22  ;;  %vm1393_vm3 = vweird.f32 %v4127_v10  ;;  %1622 = vmatmul.f32.gmra.mxu0 %v1531_v7 }
 0x21a   : > { %v4224_v41 = vpop.eup %2431  ;;  %v1419_v57 = vsub.f32 1.0, %v1418_v20  ;;  %vm1377_vm6 = vweird.f32 %v4045_v35  ;;  %v1381_v30 = vand.u32 2147483647, %v4045_v35  ;;  %v1384_v52 = vor.u32 1.1754944e-38, %v1383_v48 }
 0x21b   : > { %v4229_v50 = vpop.eup %2433  ;;  %v1398_v11 = vand.u32 2147483648, %v4059_v36  ;;  %v1501_v56 = vmul.f32 %v1370_v33, %v3268_v43  ;;  %vm4237_vm7 = vmor %vm1377_vm6, %vm1378_vm5  ;;  %vm1392_vm8 = vweird.f32 %v4059_v36  ;;  %v1396_v21 = vand.u32 2147483647, %v4059_v36 }
 0x21c   : > { %2435 = vrcp.f32 %v4219_v5  ;;  %v1380_v35 = vsel %vm4237_vm7, %v4120_v60, %v1376_v16  ;;  %vm1394_vm9 = vmor %vm1392_vm8, %vm1393_vm3  ;;  %v1405_v43 = vmul.f32 %v4174_v25, %v1404_v46  ;;  %v1433_v19 = vmul.f32 %v4224_v41, %v4169_v13  ;;  %v795_v18 = vpop.f32.mrf.mxu2 }
 0x21d   : > { %v1532_v31 = vmul.f32 %v1500_v12, %v854_v27  ;;  %v1395_v62 = vsel %vm1394_vm9, %v4127_v10, %v1391_v55  ;;  %v1420_v36 = vmul.f32 %v4182_v14, %v1419_v57  ;;  %v1448_v1 = vmul.f32 %v4229_v50, %v4172_v29  ;;  %v1733_v27 = vld [vmem:[%s3053_s4 + $0x70] sm:$0xff]  ;;  %v860_v7 = vpop.f32.mrf.mxu3 }
 0x21e   : > { %v1533_v24 = vmul.f32 %v1501_v56, %v792_v9  ;;  %vm1382_vm10 = vcmp.eq.f32.partialorder %v1381_v30, 8.507059e+37  ;;  %v1399_v60 = vor.u32 1.1754944e-38, %v1398_v11  ;;  %vm1397_vm11 = vcmp.eq.f32.partialorder %v1396_v21, 8.507059e+37  ;;  %1807 = vperm.xlu2 %2308, %v1733_v27  }
 0x21f   : > { %v1385_v61 = vsel %vm1382_vm10, %v1384_v52, %v1380_v35  ;;  %v1406_v4 = vadd.f32 %v4174_v25, %v1405_v43  ;;  %vm1408_vm12 = vweird.f32 %v4174_v25  ;;  %v1434_v49 = vsub.f32 1.0, %v1433_v19 }
 0x220   : > { %v1400_v39 = vsel %vm1397_vm11, %v1399_v60, %v1395_v62  ;;  %1687 = vmatmul.f32.gmra.mxu1 %v1532_v31  ;;  %v1413_v26 = vand.u32 2147483648, %v4109_v63  ;;  %v1421_v28 = vadd.f32 %v4182_v14, %v1420_v36  ;;  %vm1423_vm13 = vweird.f32 %v4182_v14 }
 0x221   : > { %v1449_v17 = vsub.f32 1.0, %v1448_v1  ;;  %1625 = vmatmul.f32.gmra.mxu0 %v1533_v24  ;;  %v1502_v53 = vmul.f32 %v1385_v61, %v3270_v44  ;;  %vm1407_vm14 = vweird.f32 %v4109_v63  ;;  %v1411_v8 = vand.u32 2147483647, %v4109_v63 }
 0x222   : > { %v4259_v10 = vpop.eup %2435  ;;  %v1428_v34 = vand.u32 2147483648, %v4116_v40  ;;  %v1503_v37 = vmul.f32 %v1400_v39, %v3285_v54  ;;  %vm4271_vm15 = vmor %vm1407_vm14, %vm1408_vm12  ;;  %vm1422_vm0 = vweird.f32 %v4116_v40  ;;  %v1426_v47 = vand.u32 2147483647, %v4116_v40 }
 0x223   : > { %v1410_v44 = vsel %vm4271_vm15, %v4174_v25, %v1406_v4  ;;  %vm1424_vm1 = vmor %vm1422_vm0, %vm1423_vm13  ;;  %v1435_v63 = vmul.f32 %v4224_v41, %v1434_v49  ;;  %v1463_v54 = vmul.f32 %v4259_v10, %v4219_v5  ;;  %v1534_v58 = vmul.f32 %v1502_v53, %v857_v15  ;;  %v1704_v53 = vld [vmem:[#allocation2] sm:$0xff] }
 0x224   : > { %v1414_v9 = vor.u32 1.1754944e-38, %v1413_v26  ;;  %v1425_v32 = vsel %vm1424_vm1, %v4182_v14, %v1421_v28  ;;  %v1450_v22 = vmul.f32 %v4229_v50, %v1449_v17  ;;  %v1535_v20 = vmul.f32 %v1503_v37, %v795_v18  ;;  %v798_v33 = vpop.f32.mrf.mxu2 }
 0x225   : > { %vm1412_vm2 = vcmp.eq.f32.partialorder %v1411_v8, 8.507059e+37  ;;  %v1429_v40 = vor.u32 1.1754944e-38, %v1428_v34  ;;  %vm1427_vm4 = vcmp.eq.f32.partialorder %v1426_v47, 8.507059e+37  ;;  %v1436_v25 = vadd.f32 %v4224_v41, %v1435_v63  ;;  %v1705_v63 = vld [vmem:[#allocation2 + $0x58] sm:$0xff] }
 0x226   : > { %v1415_v3 = vsel %vm1412_vm2, %v1414_v9, %v1410_v44  ;;  %vm1438_vm5 = vweird.f32 %v4224_v41  ;;  %v1464_v48 = vsub.f32 1.0, %v1463_v54  ;;  %v1443_v16 = vand.u32 2147483648, %v4169_v13 }
 0x227   : > { %v1430_v23 = vsel %vm1427_vm4, %v1429_v40, %v1425_v32  ;;  %v1451_v14 = vadd.f32 %v4229_v50, %v1450_v22  ;;  %vm1453_vm3 = vweird.f32 %v4229_v50  ;;  %v1504_v46 = vmul.f32 %v1415_v3, %v4551_v59 }
 0x228   : > { %1690 = vmatmul.f32.gmra.mxu1 %v1534_v58  ;;  %vm1437_vm6 = vweird.f32 %v4169_v13  ;;  %v1441_v6 = vand.u32 2147483647, %v4169_v13  ;;  %v1458_v12 = vand.u32 2147483648, %v4172_v29  ;;  %v1505_v55 = vmul.f32 %v1430_v23, %v4555_v0  ;;  %v863_v0 = vpop.f32.mrf.mxu3 }
 0x229   : > { %1628 = vmatmul.f32.gmra.mxu0 %v1535_v20  ;;  %vm1439_vm7 = vmor %vm1437_vm6, %vm1438_vm5  ;;  %vm1452_vm8 = vweird.f32 %v4172_v29  ;;  %v1456_v57 = vand.u32 2147483647, %v4172_v29  ;;  %v1465_v52 = vmul.f32 %v4259_v10, %v1464_v48  ;;  %v1536_v11 = vmul.f32 %v1504_v46, %v860_v7  ;;  %v1706_v7 = vld [vmem:[#allocation2 + $0x18] sm:$0xff] }
 0x22a   : > { %v1440_v30 = vsel %vm1439_vm7, %v4224_v41, %v1436_v25  ;;  %vm1454_vm9 = vmor %vm1452_vm8, %vm1453_vm3  ;;  %v1444_v59 = vor.u32 1.1754944e-38, %v1443_v16  ;;  %v1537_v38 = vmul.f32 %v1505_v55, %v798_v33  ;;  %vm1442_vm10 = vcmp.eq.f32.partialorder %v1441_v6, 8.507059e+37  ;;  %v1707_v16 = vld [vmem:[#allocation2 + $0x50] sm:$0xff] }
 0x22b   : > { %v1455_v56 = vsel %vm1454_vm9, %v4229_v50, %v1451_v14  ;;  %v1459_v13 = vor.u32 1.1754944e-38, %v1458_v12  ;;  %vm1457_vm11 = vcmp.eq.f32.partialorder %v1456_v57, 8.507059e+37  ;;  %v1466_v35 = vadd.f32 %v4259_v10, %v1465_v52 }
 0x22c   : > { %v1445_v21 = vsel %vm1442_vm10, %v1444_v59, %v1440_v30  ;;  %vm1468_vm12 = vweird.f32 %v4259_v10  ;;  %v1473_v29 = vand.u32 2147483648, %v4219_v5  ;;  %vm1467_vm13 = vweird.f32 %v4219_v5  ;;  %v801_v43 = vpop.f32.mrf.mxu2  ;;  %v1708_v30 = vld [vmem:[#allocation2 + $0x68] sm:$0xff] }
 0x22d   : > { %v1460_v15 = vsel %vm1457_vm11, %v1459_v13, %v1455_v56  ;;  %v1506_v41 = vmul.f32 %v1445_v21, %v4566_v2  ;;  %v1471_v50 = vand.u32 2147483647, %v4219_v5  ;;  %vm1469_vm14 = vmor %vm1467_vm13, %vm1468_vm12  ;;  %v1709_v21 = vld [vmem:[#allocation2 + $0x8] sm:$0xff] }
 0x22e   : > { %v1507_v19 = vmul.f32 %v1460_v15, %v4567_v42  ;;  %v1470_v31 = vsel %vm1469_vm14, %v4259_v10, %v1466_v35  ;;  %v1474_v36 = vor.u32 1.1754944e-38, %v1473_v29  ;;  %v1703_v42 = vld [vmem:[#allocation2 + $0x30] sm:$0xff] }
 0x22f   : > { %v1538_v62 = vmul.f32 %v1506_v41, %v863_v0  ;;  %vm1472_vm15 = vcmp.eq.f32.partialorder %v1471_v50, 8.507059e+37 }
 0x230   : > { %1693 = vmatmul.f32.gmra.mxu1 %v1536_v11  ;;  %v1539_v1 = vmul.f32 %v1507_v19, %v801_v43  ;;  %v1475_v24 = vsel %vm1472_vm15, %v1474_v36, %v1470_v31  ;;  %v866_v60 = vpop.f32.mrf.mxu3  ;;  %v1710_v43 = vld [vmem:[#allocation2 + $0x48] sm:$0xff] }
 0x231   : > { %1631 = vmatmul.f32.gmra.mxu0 %v1537_v38  ;;  %v1508_v2 = vmul.f32 %v1475_v24, %v4573_v45 }
 0x233   : > { %v1540_v39 = vmul.f32 %v1508_v2, %v866_v60  ;;  %v1711_v60 = vld [vmem:[#allocation2 + $0x40] sm:$0xff] }
 0x234   : > { %v1590_v18 = vpop.f32.mrf.mxu0 }
 0x235   : > { %v1655_v61 = vpop.f32.mrf.mxu1 }
 0x236   : > { %v1656_v5 = vadd.f32 %v1655_v61, %v1590_v18 }
 0x238   : > { %1696 = vmatmul.f32.gmra.mxu1 %v1538_v62 }
 0x239   : > { %1634 = vmatmul.f32.gmra.mxu0 %v1539_v1 }
 0x23d   : > { %v1758_v23 = vpop.permute.xlu2 %1757 }
 0x23e   : > { %v1593_v27 = vpop.f32.mrf.mxu0  ;;  %v1658_v10 = vpop.f32.mrf.mxu1 }
 0x23f   : > { %v1659_v28 = vadd.f32 %v1658_v10, %v1593_v27 }
 0x240   : > { %1699 = vmatmul.f32.gmra.mxu1 %v1540_v39 }
 0x244   : > { %v1738_v4 = vpop.permute.xlu0 %1737 }
 0x245   : > { %v1815_v49 = vmul.f32 %v1738_v4, %v1656_v5  ;;  %v1748_v45 = vpop.permute.xlu1 %1747 }
 0x246   : > { %v1763_v12 = vpop.permute.xlu2 %1762 }
 0x247   : > { %v1831_v26 = vadd.f32 %v1815_v49, %v1703_v42  ;;  %v1712_v42 = vld [vmem:[#allocation2 + $0x20] sm:$0xff] }
 0x249   : > { %1847 = vst [vmem:[#allocation2 + $0x30] sm:$0xff] %v1831_v26 }
 0x24c   : > { %v1743_v17 = vpop.permute.xlu0 %1742 }
 0x24d   : > { %v1816_v8 = vmul.f32 %v1743_v17, %v1659_v28  ;;  %v1753_v32 = vpop.permute.xlu1 %1752 }
 0x24e   : > { %v1596_v37 = vpop.f32.mrf.mxu0 }
 0x24f   : > { %v1832_v34 = vadd.f32 %v1816_v8, %v1704_v53  ;;  %v1713_v53 = vld [vmem:[#allocation2 + $0x10] sm:$0xff] }
 0x251   : > { %1848 = vst [vmem:[#allocation2] sm:$0xff] %v1832_v34 }
 0x254   : > { %v1768_v56 = vpop.permute.xlu0 %1767 }
 0x255   : > { %v1661_v51 = vpop.f32.mrf.mxu1  ;;  %v1773_v29 = vpop.permute.xlu1 %1772 }
 0x256   : > { %v1662_v47 = vadd.f32 %v1661_v51, %v1596_v37  ;;  %v1599_v44 = vpop.f32.mrf.mxu0 }
 0x258   : > { %v1817_v54 = vmul.f32 %v1748_v45, %v1662_v47 }
 0x25a   : > { %v1833_v58 = vadd.f32 %v1817_v54, %v1705_v63 }
 0x25c   : > { %1849 = vst [vmem:[#allocation2 + $0x58] sm:$0xff] %v1833_v58  ;;  %v1778_v36 = vpop.permute.xlu2 %1777 }
 0x25d   : > { %v1664_v9 = vpop.f32.mrf.mxu1 }
 0x25e   : > { %v1665_v22 = vadd.f32 %v1664_v9, %v1599_v44  ;;  %v1602_v20 = vpop.f32.mrf.mxu0  ;;  %v1714_v44 = vld [vmem:[#allocation2 + $0x38] sm:$0xff] }
 0x25f   : > { %v1783_v4 = vpop.permute.xlu0 %1782 }
 0x260   : > { %v1818_v40 = vmul.f32 %v1753_v32, %v1665_v22  ;;  %v1715_v22 = vld [vmem:[#allocation2 + $0x60] sm:$0xff] }
 0x262   : > { %v1834_v3 = vadd.f32 %v1818_v40, %v1706_v7 }
 0x264   : > { %1850 = vst [vmem:[#allocation2 + $0x18] sm:$0xff] %v1834_v3 }
 0x265   : > { %v1667_v25 = vpop.f32.mrf.mxu1 }
 0x266   : > { %v1668_v48 = vadd.f32 %v1667_v25, %v1602_v20  ;;  %v1605_v33 = vpop.f32.mrf.mxu0 }
 0x267   : > { %v1798_v32 = vpop.permute.xlu0 %1797 }
 0x268   : > { %v1819_v14 = vmul.f32 %v1758_v23, %v1668_v48  ;;  %v1716_v48 = vld [vmem:[#allocation2 + $0x70] sm:$0xff] }
 0x26a   : > { %v1835_v46 = vadd.f32 %v1819_v14, %v1707_v16 }
 0x26b   : > { %v1793_v47 = vpop.permute.xlu2 %1792 }
 0x26c   : > { %1851 = vst [vmem:[#allocation2 + $0x50] sm:$0xff] %v1835_v46  ;;  %v1788_v26 = vpop.permute.xlu1 %1787 }
 0x26d   : > { %v1670_v6 = vpop.f32.mrf.mxu1 }
 0x26e   : > { %v1671_v55 = vadd.f32 %v1670_v6, %v1605_v33  ;;  %v1608_v57 = vpop.f32.mrf.mxu0 }
 0x270   : > { %v1820_v52 = vmul.f32 %v1763_v12, %v1671_v55  ;;  %v1717_v55 = vld [vmem:[#allocation2 + $0x78] sm:$0xff] }
 0x272   : > { %v1836_v11 = vadd.f32 %v1820_v52, %v1708_v30 }
 0x274   : > { %1852 = vst [vmem:[#allocation2 + $0x68] sm:$0xff] %v1836_v11 }
 0x275   : > { %v1673_v59 = vpop.f32.mrf.mxu1 }
 0x276   : > { %v1674_v38 = vadd.f32 %v1673_v59, %v1608_v57  ;;  %v1611_v13 = vpop.f32.mrf.mxu0  ;;  %v1803_v25 = vpop.permute.xlu1 %1802 }
 0x278   : > { %v1821_v0 = vmul.f32 %v1768_v56, %v1674_v38  ;;  %v1808_v12 = vpop.permute.xlu2 %1807  ;;  %v1813_v56 = vpop.permute.xlu0 %1812  ;;  %v1718_v38 = vld [vmem:[#allocation2 + $0x28] sm:$0xff] }
 0x27a   : > { %v1837_v15 = vadd.f32 %v1821_v0, %v1709_v21 }
 0x27c   : > { %1853 = vst [vmem:[#allocation2 + $0x8] sm:$0xff] %v1837_v15 }
 0x27d   : > { %v1676_v35 = vpop.f32.mrf.mxu1 }
 0x27e   : > { %v1677_v41 = vadd.f32 %v1676_v35, %v1611_v13  ;;  %v1614_v50 = vpop.f32.mrf.mxu0 }
 0x280   : > { %v1822_v19 = vmul.f32 %v1773_v29, %v1677_v41 }
 0x282   : > { %v1838_v31 = vadd.f32 %v1822_v19, %v1710_v43 }
 0x284   : > { %1854 = vst [vmem:[#allocation2 + $0x48] sm:$0xff] %v1838_v31 }
 0x285   : > { %v1679_v62 = vpop.f32.mrf.mxu1 }
 0x286   : > { %v1680_v1 = vadd.f32 %v1679_v62, %v1614_v50  ;;  %v1617_v24 = vpop.f32.mrf.mxu0 }
 0x288   : > { %v1823_v2 = vmul.f32 %v1778_v36, %v1680_v1 }
 0x28a   : > { %v1839_v18 = vadd.f32 %v1823_v2, %v1711_v60 }
 0x28c   : > { %1855 = vst [vmem:[#allocation2 + $0x40] sm:$0xff] %v1839_v18 }
 0x28d   : > { %v1682_v61 = vpop.f32.mrf.mxu1 }
 0x28e   : > { %v1683_v39 = vadd.f32 %v1682_v61, %v1617_v24  ;;  %v1620_v5 = vpop.f32.mrf.mxu0 }
 0x290   : > { %v1824_v49 = vmul.f32 %v1783_v4, %v1683_v39 }
 0x292   : > { %v1840_v27 = vadd.f32 %v1824_v49, %v1712_v42 }
 0x294   : > { %1856 = vst [vmem:[#allocation2 + $0x20] sm:$0xff] %v1840_v27 }
 0x295   : > { %v1685_v10 = vpop.f32.mrf.mxu1 }
 0x296   : > { %v1686_v28 = vadd.f32 %v1685_v10, %v1620_v5  ;;  %v1623_v17 = vpop.f32.mrf.mxu0 }
 0x298   : > { %v1825_v8 = vmul.f32 %v1788_v26, %v1686_v28 }
 0x29a   : > { %v1841_v34 = vadd.f32 %v1825_v8, %v1713_v53 }
 0x29c   : > { %1857 = vst [vmem:[#allocation2 + $0x10] sm:$0xff] %v1841_v34 }
 0x29d   : > { %v1688_v37 = vpop.f32.mrf.mxu1 }
 0x29e   : > { %v1689_v45 = vadd.f32 %v1688_v37, %v1623_v17  ;;  %v1626_v51 = vpop.f32.mrf.mxu0 }
 0x2a0   : > { %v1826_v63 = vmul.f32 %v1793_v47, %v1689_v45 }
 0x2a2   : > { %v1842_v54 = vadd.f32 %v1826_v63, %v1714_v44 }
 0x2a4   : > { %1858 = vst [vmem:[#allocation2 + $0x38] sm:$0xff] %v1842_v54 }
 0x2a5   : > { %v1691_v58 = vpop.f32.mrf.mxu1 }
 0x2a6   : > { %v1692_v9 = vadd.f32 %v1691_v58, %v1626_v51  ;;  %v1629_v20 = vpop.f32.mrf.mxu0 }
 0x2a8   : > { %v1827_v7 = vmul.f32 %v1798_v32, %v1692_v9 }
 0x2aa   : > { %v1843_v40 = vadd.f32 %v1827_v7, %v1715_v22 }
 0x2ac   : > { %1859 = vst [vmem:[#allocation2 + $0x60] sm:$0xff] %v1843_v40 }
 0x2ad   : > { %v1694_v3 = vpop.f32.mrf.mxu1 }
 0x2ae   : > { %v1695_v23 = vadd.f32 %v1694_v3, %v1629_v20  ;;  %v1632_v16 = vpop.f32.mrf.mxu0 }
 0x2b0   : > { %v1828_v33 = vmul.f32 %v1803_v25, %v1695_v23 }
 0x2b2   : > { %v1844_v14 = vadd.f32 %v1828_v33, %v1716_v48 }
 0x2b4   : > { %1860 = vst [vmem:[#allocation2 + $0x70] sm:$0xff] %v1844_v14 }
 0x2b5   : > { %v1697_v46 = vpop.f32.mrf.mxu1 }
 0x2b6   : > { %v1698_v6 = vadd.f32 %v1697_v46, %v1632_v16  ;;  %v1635_v52 = vpop.f32.mrf.mxu0 }
 0x2b8   : > { %v1829_v57 = vmul.f32 %v1808_v12, %v1698_v6 }
 0x2ba   : > { %v1845_v30 = vadd.f32 %v1829_v57, %v1717_v55 }
 0x2bc   : > { %1861 = vst [vmem:[#allocation2 + $0x78] sm:$0xff] %v1845_v30 }
 0x2bd   : > { %v1700_v11 = vpop.f32.mrf.mxu1 }
 0x2be   : > { %v1701_v59 = vadd.f32 %v1700_v11, %v1635_v52 }
 0x2c0   : > { %v1830_v13 = vmul.f32 %v1813_v56, %v1701_v59 }
 0x2c2   : > { %v1846_v21 = vadd.f32 %v1830_v13, %v1718_v38 }
 0x2c4   : > { %1862 = vst [vmem:[#allocation2 + $0x28] sm:$0xff] %v1846_v21 }
 0x2c5 PF: > { %s4586_s5 = sld [smem:[#allocation30_spill]] }
 0x2cb   : > { %p1863_p13 = scmp.eq.s32.totalorder %s4586_s5, 3 }
 0x2cc   : > { %v1868_v0 = vld [vmem:[#allocation2 + $0x30] sm:$0xff] (%p1863_p13)  ;;  %v1869_v15 = vld [vmem:[#allocation2] sm:$0xff] (%p1863_p13)  ;;  %v1870_v35 = vld [vmem:[#allocation2 + $0x58] sm:$0xff] (%p1863_p13)  ;;  %s4587_s9 = sld [smem:[#allocation52_spill]] (%p1863_p13) }
 0x2cd   : > { %1867 = sbr.rel (!%p1863_p13) target bundleno = 738 (0x2e2), region = 64  ;;  %v1871_v29 = vld [vmem:[#allocation2 + $0x18] sm:$0xff] (%p1863_p13)  ;;  %v1872_v41 = vld [vmem:[#allocation2 + $0x50] sm:$0xff] (%p1863_p13)  ;;  %v1873_v50 = vld [vmem:[#allocation2 + $0x68] sm:$0xff] (%p1863_p13) }
 0x2ce   : > { %v1874_v43 = vld [vmem:[#allocation2 + $0x8] sm:$0xff] (%p1863_p13)  ;;  %v1876_v31 = vld [vmem:[#allocation2 + $0x40] sm:$0xff] (%p1863_p13)  ;;  %v1878_v36 = vld [vmem:[#allocation2 + $0x10] sm:$0xff] (%p1863_p13) }
 0x2cf   : > { %v1875_v19 = vld [vmem:[#allocation2 + $0x48] sm:$0xff] (%p1863_p13)  ;;  %v1877_v62 = vld [vmem:[#allocation2 + $0x20] sm:$0xff] (%p1863_p13)  ;;  %v1879_v1 = vld [vmem:[#allocation2 + $0x38] sm:$0xff] (%p1863_p13) }
 0x2d0   : > { %v1880_v24 = vld [vmem:[#allocation2 + $0x60] sm:$0xff] (%p1863_p13)  ;;  %v1881_v60 = vld [vmem:[#allocation2 + $0x70] sm:$0xff] (%p1863_p13)  ;;  %v1882_v2 = vld [vmem:[#allocation2 + $0x78] sm:$0xff] (%p1863_p13) }
 0x2d1   : > { %v1883_v18 = vld [vmem:[#allocation2 + $0x28] sm:$0xff] (%p1863_p13) }
 0x2d2   : > { %1884 = vst [vmem:[%s4587_s9] sm:$0xff] %v1868_v0 }
 0x2d3   : > { %1885 = vst [vmem:[%s4587_s9 + $0x8] sm:$0xff] %v1869_v15 }
 0x2d4   : > { %1886 = vst [vmem:[%s4587_s9 + $0x10] sm:$0xff] %v1870_v35 }
 0x2d5   : > { %1887 = vst [vmem:[%s4587_s9 + $0x18] sm:$0xff] %v1871_v29 }
 0x2d6   : > { %1888 = vst [vmem:[%s4587_s9 + $0x20] sm:$0xff] %v1872_v41 }
 0x2d7   : > { %1889 = vst [vmem:[%s4587_s9 + $0x28] sm:$0xff] %v1873_v50 }
 0x2d8   : > { %1890 = vst [vmem:[%s4587_s9 + $0x30] sm:$0xff] %v1874_v43 }
 0x2d9   : > { %1891 = vst [vmem:[%s4587_s9 + $0x38] sm:$0xff] %v1875_v19 }
 0x2da   : > { %1892 = vst [vmem:[%s4587_s9 + $0x40] sm:$0xff] %v1876_v31 }
 0x2db   : > { %1893 = vst [vmem:[%s4587_s9 + $0x48] sm:$0xff] %v1877_v62 }
 0x2dc   : > { %1894 = vst [vmem:[%s4587_s9 + $0x50] sm:$0xff] %v1878_v36 }
 0x2dd   : > { %1895 = vst [vmem:[%s4587_s9 + $0x58] sm:$0xff] %v1879_v1 }
 0x2de   : > { %1896 = vst [vmem:[%s4587_s9 + $0x60] sm:$0xff] %v1880_v24 }
 0x2df   : > { %1897 = vst [vmem:[%s4587_s9 + $0x68] sm:$0xff] %v1881_v60 }
 0x2e0   : > { %1898 = vst [vmem:[%s4587_s9 + $0x70] sm:$0xff] %v1882_v2 }
 0x2e1   : > { %1899 = vst [vmem:[%s4587_s9 + $0x78] sm:$0xff] %v1883_v18 }
 0x2e2 PF: > { %s42_s25 = sadd.s32 1, %s2671_s25   ;;  %s4588_s18 = sld [smem:[#allocation28_spill]] }
 0x2e3   : > { %p39_p1 = scmp.ge.s32.totalorder %s42_s25, 6   ;;  %s4589_s19 = sld [smem:[#allocation29_spill]] }
 0x2e4   : > { %s4590_s2 = sld [smem:[#allocation34_spill]]  ;;  %s4592_s0 = smov %s2631_s1 }
 0x2e5   : > { %s4591_s30 = sld [smem:[#allocation31_spill]]  ;;  %s4593_s1 = smov %s2635_s17 }
 0x2e6   : > { %s4594_s17 = smov %s2987_s29  ;;  %s4595_s20 = smov %s2655_s21 }
 0x2e7   : > { %s4596_s21 = smov %s2659_s22  ;;  %s4597_s22 = smov %s2920_s13 }
 0x2e8   : > { %s4598_s23 = smov %s2667_s24  ;;  %41 = sbr.rel (!%p39_p1) target bundleno = 21 (0x15), region = 122 }
 0x2eb   : > { %s4599_s24 = smov %s4591_s30 }
 0x2ed   :  { %1922 = vsyncpa [#allocation8], 1 }
 0x2ee   :  { %1924 = vsyncpa [#allocation8 + $0x1], 1 }
 0x2ef   :  { %1925 = vsyncpa [#allocation10], 1 }
 0x2f0   :  { %1927 = vsyncpa [#allocation10 + $0x1], 1 }

</bundles_post_ra>
